<compile_context>
chip_gen: v5e
topology: v5e:2x2
jax: 0.10.0
libtpu: 0.0.40
codegen_flags: <defaults>
</compile_context>

<pallas_src>
import jax
import jax.numpy as jnp
import numpy as np
from jax.experimental import pallas as pl
from jax.experimental.pallas import tpu as pltpu


def _decoder_kernel(x_ref, lo_ref, wx_ref, wl_ref, sel_ref, u_ref, b_ref, o_ref):
    """Fused upsample(x) + upsample(conv1(low)) + concat + 3x3 VALID conv2.

    Grid: (N,) -- one batch element per step.

      x_ref  : (Hs*Ws, Cx)        pre-upsample ASPP features, spatial flattened into M
      lo_ref : (Hs*Ws, 48)        pre-upsample conv1(low_level_features)
      wx_ref : (Cx, LANES)        conv2 weight, x half; all 9 taps packed along lanes
      wl_ref : (48, LANES)        conv2 weight, conv1(low) half; taps packed along lanes
      sel_ref: (9, Ho*Wo, Hs*Ws)  one-hot nearest-x4 + 3x3-window gather per tap
      u_ref  : (9, LANES, Cout)   one-hot lane-unpack (tap*Cout+co -> co) per tap
      b_ref  : (1, Cout)          conv2 bias (f32)
      o_ref  : (Ho*Wo, Cout)      conv2 output for this batch element (f32)
    """
    cdt = x_ref.dtype

    # One MXU contraction over all 2048 (+48) input channels.  Because the 9 taps
    # are packed into the output lanes, this single matmul yields every tap's
    # partial sum for every pre-upsample pixel:  part[r, tap*Cout + co].
    part = jnp.dot(x_ref[...], wx_ref[...], preferred_element_type=jnp.float32)
    part = part + jnp.dot(lo_ref[...], wl_ref[...], preferred_element_type=jnp.float32)
    part = part.astype(cdt)  # one rounding; the gathers below are exact one-hot ops

    acc = jnp.zeros(o_ref.shape, jnp.float32)
    for tap in range(9):
        # Lane-unpack this tap's Cout channels (exact one-hot matmul), then apply
        # the fused nearest-x4 upsample + 3x3 window gather to output positions
        # (also an exact one-hot matmul), accumulating the tap sum in f32.
        cols = jnp.dot(part, u_ref[tap],
                       preferred_element_type=jnp.float32).astype(cdt)  # (Hs*Ws, Cout)
        acc = acc + jnp.dot(sel_ref[tap], cols,
                            preferred_element_type=jnp.float32)          # (Ho*Wo, Cout)

    o_ref[...] = acc + b_ref[...]


def pack_decoder_params(params, *, compute_dtype=jnp.bfloat16):
    """One-time repack of the Decoder weights (hoisted out of the per-call hot path)."""
    f32 = jnp.float32
    w1 = params["w1"].astype(f32)                       # (48, Cl, 1, 1)
    c48 = w1.shape[0]                                   # 48
    w2 = params["w2"].astype(f32)                       # (Cout, Cin2, 3, 3)
    cout, cin2 = w2.shape[0], w2.shape[1]
    cx = cin2 - c48                                     # 2048

    # Pack all 9 taps along the lane dim: lane = (kh*3 + kw)*Cout + co.
    lanes = ((9 * cout + 127) // 128) * 128             # 128 for Cout=8
    w2_t = jnp.transpose(w2, (1, 2, 3, 0)).reshape(cin2, 9 * cout)
    w2_p = jnp.pad(w2_t, ((0, 0), (0, lanes - 9 * cout)))

    return {
        "w1": w1.reshape(c48, -1),                      # (48, Cl)
        "b1": params["b1"].astype(f32),                 # (48,)
        "wx": w2_p[:cx].astype(compute_dtype),          # (Cx, LANES)
        "wl": w2_p[cx:].astype(compute_dtype),          # (48, LANES)
        "b2": params["b2"].astype(f32).reshape(1, cout),  # (1, Cout)
    }


def decoder_forward(x_nchw, low_nchw, packed, *, compute_dtype=jnp.bfloat16):
    """Forward pass of Decoder(low_level_channels, output_channels). NCHW in / NCHW out."""
    cdt = compute_dtype
    N, Cx, Hs, Ws = x_nchw.shape
    wx, wl = packed["wx"], packed["wl"]
    assert wx.shape[0] == Cx, (wx.shape, Cx)
    lanes = wx.shape[1]
    C48 = wl.shape[0]
    Cout = packed["b2"].shape[1]

    # Cast BEFORE the NCHW->NHWC layout change (halves the transpose bytes), and
    # flatten the spatial dims into the matmul M dimension.
    x = jnp.transpose(x_nchw.astype(cdt), (0, 2, 3, 1)).reshape(N, Hs * Ws, Cx)

    # conv1 (1x1, Cl -> 48) on the tiny pre-upsample map stays in XLA (f32), its x4
    # upsample is fused into the Pallas kernel below.
    low = jnp.transpose(low_nchw, (0, 2, 3, 1)).astype(jnp.float32)      # (N, Hs, Ws, Cl)
    low48 = jnp.einsum("nhwc,oc->nhwo", low, packed["w1"]) + packed["b1"]
    low48 = low48.reshape(N, Hs * Ws, C48).astype(cdt)

    H, W = 4 * Hs, 4 * Ws                                                # nearest x4
    Ho, Wo = H - 2, W - 2                                                # 3x3 VALID conv

    # One-hot gather matrices (host numpy -> traced constants; exact in bf16):
    #   sel[tap, ho*Wo+wo, r] = 1  iff  r == ((ho+kh)//4)*Ws + (wo+kw)//4
    #   u[tap, l, co]         = 1  iff  l == tap*Cout + co
    r_row = (np.arange(Ho)[None, :] + np.arange(3)[:, None]) // 4        # (3, Ho)
    r_col = (np.arange(Wo)[None, :] + np.arange(3)[:, None]) // 4        # (3, Wo)
    src = (r_row[:, None, :, None] * Ws + r_col[None, :, None, :]).reshape(9, Ho * Wo)
    sel_np = (src[:, :, None] == np.arange(Hs * Ws)[None, None, :]).astype(np.float32)
    sel = jnp.asarray(sel_np, dtype=cdt)                                 # (9, Ho*Wo, Hs*Ws)

    unpack_np = np.zeros((9, lanes, Cout), np.float32)
    for t in range(9):
        unpack_np[t, t * Cout:(t + 1) * Cout, :] = np.eye(Cout, dtype=np.float32)
    unpack = jnp.asarray(unpack_np, dtype=cdt)                           # (9, LANES, Cout)

    # Grid = (N,): weights/selectors have constant block indices (fetched once),
    # x / conv1(low) are fetched once per batch element, and there are only N fat
    # grid steps (no per-row / per-K stepping overhead).  For realistic DeepLab
    # spatial sizes one would add an Ho-block grid axis for more parallel tiles.
    y = pl.pallas_call(
        _decoder_kernel,
        out_shape=jax.ShapeDtypeStruct((N, Ho * Wo, Cout), jnp.float32),
        grid=(N,),
        in_specs=[
            pl.BlockSpec((None, Hs * Ws, Cx), lambda n: (n, 0, 0)),
            pl.BlockSpec((None, Hs * Ws, C48), lambda n: (n, 0, 0)),
            pl.BlockSpec((Cx, lanes), lambda n: (0, 0)),        # resident weight
            pl.BlockSpec((C48, lanes), lambda n: (0, 0)),       # resident weight
            pl.BlockSpec((9, Ho * Wo, Hs * Ws), lambda n: (0, 0, 0)),
            pl.BlockSpec((9, lanes, Cout), lambda n: (0, 0, 0)),
            pl.BlockSpec((1, Cout), lambda n: (0, 0)),
        ],
        out_specs=pl.BlockSpec((None, Ho * Wo, Cout), lambda n: (n, 0, 0)),
        compiler_params=pltpu.CompilerParams(
            dimension_semantics=("parallel",),
            vmem_limit_bytes=32 << 20,   # actual footprint ~1-2 MiB; safe on v7x's 64 MiB
        ),
    )(x, low48, wx, wl, sel, unpack, packed["b2"])

    # Epilogue: only the real Cout channels were written (no 128-lane pad to slice);
    # transpose the small tensor first, then do the final materialized nearest-x4.
    y = y.reshape(N, Ho, Wo, Cout)
    y = jnp.transpose(y, (0, 3, 1, 2))                                   # (N, Cout, Ho, Wo)
    y = jnp.repeat(jnp.repeat(y, 4, axis=2), 4, axis=3)                  # (N, Cout, 4Ho, 4Wo)
    return y


def _reference_forward(x_nchw, low_nchw, params):
    """Pure-XLA fp32 reference with the exact PyTorch semantics (for validation)."""
    f32 = jnp.float32
    up4 = lambda t: jnp.repeat(jnp.repeat(t, 4, axis=1), 4, axis=2)
    x = jnp.transpose(x_nchw, (0, 2, 3, 1)).astype(f32)
    low = jnp.transpose(low_nchw, (0, 2, 3, 1)).astype(f32)
    x = up4(x)
    w1 = params["w1"].astype(f32).reshape(params["w1"].shape[0], -1)
    low = jnp.einsum("nhwc,oc->nhwo", low, w1,
                     precision=jax.lax.Precision.HIGHEST) + params["b1"].astype(f32)
    low = up4(low)
    cat = jnp.concatenate([x, low], axis=-1)
    w2 = jnp.transpose(params["w2"].astype(f32), (2, 3, 1, 0))           # (3,3,Cin,Cout)
    y = jax.lax.conv_general_dilated(
        cat, w2, window_strides=(1, 1), padding="VALID",
        dimension_numbers=("NHWC", "HWIO", "NHWC"),
        precision=jax.lax.Precision.HIGHEST)
    y = y + params["b2"].astype(f32)
    y = up4(y)
    return jnp.transpose(y, (0, 3, 1, 2))


if __name__ == "__main__":
    key = jax.random.PRNGKey(0)
    k1, k2, k3, k4, k5, k6 = jax.random.split(key, 6)

    # The module hard-codes conv2 in_channels = 2096 = 2048 (ASPP x) + 48 (conv1),
    # so x must carry 2048 channels; spatial dims stay small.
    low_level_channels = 4
    output_channels = 8
    N, Hs, Ws = 2, 2, 2

    x = jax.random.normal(k1, (N, 2048, Hs, Ws), dtype=jnp.float32)
    low = jax.random.normal(k2, (N, low_level_channels, Hs, Ws), dtype=jnp.float32)

    params = {
        # conv1: Conv2d(low_level_channels, 48, kernel_size=1)
        "w1": 0.1 * jax.random.normal(k3, (48, low_level_channels, 1, 1), jnp.float32),
        "b1": 0.1 * jax.random.normal(k4, (48,), jnp.float32),
        # conv2: Conv2d(2096, output_channels, kernel_size=3)
        "w2": 0.01 * jax.random.normal(k5, (output_channels, 2096, 3, 3), jnp.float32),
        "b2": 0.1 * jax.random.normal(k6, (output_channels,), jnp.float32),
    }

    packed = pack_decoder_params(params)            # one-time weight repack (cold path)
    fwd = jax.jit(decoder_forward)
    out = jax.block_until_ready(fwd(x, low, packed))

    expected = (N, output_channels, (Hs * 4 - 2) * 4, (Ws * 4 - 2) * 4)  # (2, 8, 24, 24)
    assert out.shape == expected, (out.shape, expected)
    assert out.dtype == jnp.float32

    # Numerical check vs. fp32 XLA reference (loose tolerance: bf16 operands).
    ref = jax.block_until_ready(_reference_forward(x, low, params))
    np.testing.assert_allclose(np.asarray(out), np.asarray(ref), rtol=5e-2, atol=1e-1)

    print("KERNEL_OK")
</pallas_src>

<mosaic_0001>
module attributes {stable_mosaic.version = 11 : i64} {
  func.func @_decoder_kernel(%arg0: i32, %arg1: memref<1x4x2048xbf16, #tpu.memory_space<vmem>>, %arg2: memref<1x4x48xbf16, #tpu.memory_space<vmem>>, %arg3: memref<2048x128xbf16, #tpu.memory_space<vmem>>, %arg4: memref<48x128xbf16, #tpu.memory_space<vmem>>, %arg5: memref<9x36x4xbf16, #tpu.memory_space<vmem>>, %arg6: memref<9x128x8xbf16, #tpu.memory_space<vmem>>, %arg7: memref<1x8xf32, #tpu.memory_space<vmem>>, %arg8: memref<1x36x8xf32, #tpu.memory_space<vmem>>) attributes {dimension_semantics = [#tpu.dimension_semantics<parallel>], iteration_bounds = array<i64: 2>, scalar_prefetch = 0 : i64, scratch_operands = 0 : i64, tpu.core_type = #tpu.core_type<tc>, window_params = [{transform_indices = @transform_0, window_bounds = array<i64: 1, 4, 2048>}, {transform_indices = @transform_1, window_bounds = array<i64: 1, 4, 48>}, {pipeline_mode = #tpu.pipeline_mode<synchronous>, transform_indices = @transform_2, window_bounds = array<i64: 2048, 128>}, {pipeline_mode = #tpu.pipeline_mode<synchronous>, transform_indices = @transform_3, window_bounds = array<i64: 48, 128>}, {pipeline_mode = #tpu.pipeline_mode<synchronous>, transform_indices = @transform_4, window_bounds = array<i64: 9, 36, 4>}, {pipeline_mode = #tpu.pipeline_mode<synchronous>, transform_indices = @transform_5, window_bounds = array<i64: 9, 128, 8>}, {pipeline_mode = #tpu.pipeline_mode<synchronous>, transform_indices = @transform_6, window_bounds = array<i64: 1, 8>}, {transform_indices = @transform_7, window_bounds = array<i64: 1, 36, 8>}]} {
    %c0 = arith.constant 0 : index
    %c0_0 = arith.constant 0 : index
    %c0_1 = arith.constant 0 : index
    %0 = vector.load %arg1[%c0, %c0_0, %c0_1] : memref<1x4x2048xbf16, #tpu.memory_space<vmem>>, vector<1x4x2048xbf16>
    %1 = vector.shape_cast %0 : vector<1x4x2048xbf16> to vector<4x2048xbf16>
    %c0_2 = arith.constant 0 : index
    %c0_3 = arith.constant 0 : index
    %2 = vector.load %arg3[%c0_2, %c0_3] : memref<2048x128xbf16, #tpu.memory_space<vmem>>, vector<2048x128xbf16>
    %cst = arith.constant dense<0.000000e+00> : vector<4x128xf32>
    %3 = tpu.matmul %1, %2, %cst {dimension_numbers = #tpu.dot_dimension_numbers<[1], [0], [0], [1], [0, 0, 1, 1], [], []>} : vector<4x2048xbf16>, vector<2048x128xbf16>, vector<4x128xf32> -> vector<4x128xf32>
    %c0_4 = arith.constant 0 : index
    %c0_5 = arith.constant 0 : index
    %c0_6 = arith.constant 0 : index
    %4 = vector.load %arg2[%c0_4, %c0_5, %c0_6] : memref<1x4x48xbf16, #tpu.memory_space<vmem>>, vector<1x4x48xbf16>
    %5 = vector.shape_cast %4 : vector<1x4x48xbf16> to vector<4x48xbf16>
    %c0_7 = arith.constant 0 : index
    %c0_8 = arith.constant 0 : index
    %6 = vector.load %arg4[%c0_7, %c0_8] : memref<48x128xbf16, #tpu.memory_space<vmem>>, vector<48x128xbf16>
    %cst_9 = arith.constant dense<0.000000e+00> : vector<4x128xf32>
    %7 = tpu.matmul %5, %6, %cst_9 {dimension_numbers = #tpu.dot_dimension_numbers<[1], [0], [0], [1], [0, 0, 1, 1], [], []>} : vector<4x48xbf16>, vector<48x128xbf16>, vector<4x128xf32> -> vector<4x128xf32>
    %8 = arith.addf %3, %7 : vector<4x128xf32>
    %9 = arith.truncf %8 : vector<4x128xf32> to vector<4x128xbf16>
    %cst_10 = arith.constant 0.000000e+00 : f32
    %10 = vector.broadcast %cst_10 : f32 to vector<36x8xf32>
    %c0_11 = arith.constant 0 : index
    %c0_12 = arith.constant 0 : index
    %c0_13 = arith.constant 0 : index
    %11 = vector.load %arg6[%c0_11, %c0_12, %c0_13] : memref<9x128x8xbf16, #tpu.memory_space<vmem>>, vector<1x128x8xbf16>
    %12 = vector.shape_cast %11 : vector<1x128x8xbf16> to vector<128x8xbf16>
    %cst_14 = arith.constant dense<0.000000e+00> : vector<4x8xf32>
    %13 = tpu.matmul %9, %12, %cst_14 {dimension_numbers = #tpu.dot_dimension_numbers<[1], [0], [0], [1], [0, 0, 1, 1], [], []>} : vector<4x128xbf16>, vector<128x8xbf16>, vector<4x8xf32> -> vector<4x8xf32>
    %14 = arith.truncf %13 : vector<4x8xf32> to vector<4x8xbf16>
    %c0_15 = arith.constant 0 : index
    %c0_16 = arith.constant 0 : index
    %c0_17 = arith.constant 0 : index
    %15 = vector.load %arg5[%c0_15, %c0_16, %c0_17] : memref<9x36x4xbf16, #tpu.memory_space<vmem>>, vector<1x36x4xbf16>
    %16 = vector.shape_cast %15 : vector<1x36x4xbf16> to vector<36x4xbf16>
    %cst_18 = arith.constant dense<0.000000e+00> : vector<36x8xf32>
    %17 = tpu.matmul %16, %14, %cst_18 {dimension_numbers = #tpu.dot_dimension_numbers<[1], [0], [0], [1], [0, 0, 1, 1], [], []>} : vector<36x4xbf16>, vector<4x8xbf16>, vector<36x8xf32> -> vector<36x8xf32>
    %18 = arith.addf %10, %17 : vector<36x8xf32>
    %c1 = arith.constant 1 : index
    %c0_19 = arith.constant 0 : index
    %c0_20 = arith.constant 0 : index
    %19 = vector.load %arg6[%c1, %c0_19, %c0_20] : memref<9x128x8xbf16, #tpu.memory_space<vmem>>, vector<1x128x8xbf16>
    %20 = vector.shape_cast %19 : vector<1x128x8xbf16> to vector<128x8xbf16>
    %cst_21 = arith.constant dense<0.000000e+00> : vector<4x8xf32>
    %21 = tpu.matmul %9, %20, %cst_21 {dimension_numbers = #tpu.dot_dimension_numbers<[1], [0], [0], [1], [0, 0, 1, 1], [], []>} : vector<4x128xbf16>, vector<128x8xbf16>, vector<4x8xf32> -> vector<4x8xf32>
    %22 = arith.truncf %21 : vector<4x8xf32> to vector<4x8xbf16>
    %c1_22 = arith.constant 1 : index
    %c0_23 = arith.constant 0 : index
    %c0_24 = arith.constant 0 : index
    %23 = vector.load %arg5[%c1_22, %c0_23, %c0_24] : memref<9x36x4xbf16, #tpu.memory_space<vmem>>, vector<1x36x4xbf16>
    %24 = vector.shape_cast %23 : vector<1x36x4xbf16> to vector<36x4xbf16>
    %cst_25 = arith.constant dense<0.000000e+00> : vector<36x8xf32>
    %25 = tpu.matmul %24, %22, %cst_25 {dimension_numbers = #tpu.dot_dimension_numbers<[1], [0], [0], [1], [0, 0, 1, 1], [], []>} : vector<36x4xbf16>, vector<4x8xbf16>, vector<36x8xf32> -> vector<36x8xf32>
    %26 = arith.addf %18, %25 : vector<36x8xf32>
    %c2 = arith.constant 2 : index
    %c0_26 = arith.constant 0 : index
    %c0_27 = arith.constant 0 : index
    %27 = vector.load %arg6[%c2, %c0_26, %c0_27] : memref<9x128x8xbf16, #tpu.memory_space<vmem>>, vector<1x128x8xbf16>
    %28 = vector.shape_cast %27 : vector<1x128x8xbf16> to vector<128x8xbf16>
    %cst_28 = arith.constant dense<0.000000e+00> : vector<4x8xf32>
    %29 = tpu.matmul %9, %28, %cst_28 {dimension_numbers = #tpu.dot_dimension_numbers<[1], [0], [0], [1], [0, 0, 1, 1], [], []>} : vector<4x128xbf16>, vector<128x8xbf16>, vector<4x8xf32> -> vector<4x8xf32>
    %30 = arith.truncf %29 : vector<4x8xf32> to vector<4x8xbf16>
    %c2_29 = arith.constant 2 : index
    %c0_30 = arith.constant 0 : index
    %c0_31 = arith.constant 0 : index
    %31 = vector.load %arg5[%c2_29, %c0_30, %c0_31] : memref<9x36x4xbf16, #tpu.memory_space<vmem>>, vector<1x36x4xbf16>
    %32 = vector.shape_cast %31 : vector<1x36x4xbf16> to vector<36x4xbf16>
    %cst_32 = arith.constant dense<0.000000e+00> : vector<36x8xf32>
    %33 = tpu.matmul %32, %30, %cst_32 {dimension_numbers = #tpu.dot_dimension_numbers<[1], [0], [0], [1], [0, 0, 1, 1], [], []>} : vector<36x4xbf16>, vector<4x8xbf16>, vector<36x8xf32> -> vector<36x8xf32>
    %34 = arith.addf %26, %33 : vector<36x8xf32>
    %c3 = arith.constant 3 : index
    %c0_33 = arith.constant 0 : index
    %c0_34 = arith.constant 0 : index
    %35 = vector.load %arg6[%c3, %c0_33, %c0_34] : memref<9x128x8xbf16, #tpu.memory_space<vmem>>, vector<1x128x8xbf16>
    %36 = vector.shape_cast %35 : vector<1x128x8xbf16> to vector<128x8xbf16>
    %cst_35 = arith.constant dense<0.000000e+00> : vector<4x8xf32>
    %37 = tpu.matmul %9, %36, %cst_35 {dimension_numbers = #tpu.dot_dimension_numbers<[1], [0], [0], [1], [0, 0, 1, 1], [], []>} : vector<4x128xbf16>, vector<128x8xbf16>, vector<4x8xf32> -> vector<4x8xf32>
    %38 = arith.truncf %37 : vector<4x8xf32> to vector<4x8xbf16>
    %c3_36 = arith.constant 3 : index
    %c0_37 = arith.constant 0 : index
    %c0_38 = arith.constant 0 : index
    %39 = vector.load %arg5[%c3_36, %c0_37, %c0_38] : memref<9x36x4xbf16, #tpu.memory_space<vmem>>, vector<1x36x4xbf16>
    %40 = vector.shape_cast %39 : vector<1x36x4xbf16> to vector<36x4xbf16>
    %cst_39 = arith.constant dense<0.000000e+00> : vector<36x8xf32>
    %41 = tpu.matmul %40, %38, %cst_39 {dimension_numbers = #tpu.dot_dimension_numbers<[1], [0], [0], [1], [0, 0, 1, 1], [], []>} : vector<36x4xbf16>, vector<4x8xbf16>, vector<36x8xf32> -> vector<36x8xf32>
    %42 = arith.addf %34, %41 : vector<36x8xf32>
    %c4 = arith.constant 4 : index
    %c0_40 = arith.constant 0 : index
    %c0_41 = arith.constant 0 : index
    %43 = vector.load %arg6[%c4, %c0_40, %c0_41] : memref<9x128x8xbf16, #tpu.memory_space<vmem>>, vector<1x128x8xbf16>
    %44 = vector.shape_cast %43 : vector<1x128x8xbf16> to vector<128x8xbf16>
    %cst_42 = arith.constant dense<0.000000e+00> : vector<4x8xf32>
    %45 = tpu.matmul %9, %44, %cst_42 {dimension_numbers = #tpu.dot_dimension_numbers<[1], [0], [0], [1], [0, 0, 1, 1], [], []>} : vector<4x128xbf16>, vector<128x8xbf16>, vector<4x8xf32> -> vector<4x8xf32>
    %46 = arith.truncf %45 : vector<4x8xf32> to vector<4x8xbf16>
    %c4_43 = arith.constant 4 : index
    %c0_44 = arith.constant 0 : index
    %c0_45 = arith.constant 0 : index
    %47 = vector.load %arg5[%c4_43, %c0_44, %c0_45] : memref<9x36x4xbf16, #tpu.memory_space<vmem>>, vector<1x36x4xbf16>
    %48 = vector.shape_cast %47 : vector<1x36x4xbf16> to vector<36x4xbf16>
    %cst_46 = arith.constant dense<0.000000e+00> : vector<36x8xf32>
    %49 = tpu.matmul %48, %46, %cst_46 {dimension_numbers = #tpu.dot_dimension_numbers<[1], [0], [0], [1], [0, 0, 1, 1], [], []>} : vector<36x4xbf16>, vector<4x8xbf16>, vector<36x8xf32> -> vector<36x8xf32>
    %50 = arith.addf %42, %49 : vector<36x8xf32>
    %c5 = arith.constant 5 : index
    %c0_47 = arith.constant 0 : index
    %c0_48 = arith.constant 0 : index
    %51 = vector.load %arg6[%c5, %c0_47, %c0_48] : memref<9x128x8xbf16, #tpu.memory_space<vmem>>, vector<1x128x8xbf16>
    %52 = vector.shape_cast %51 : vector<1x128x8xbf16> to vector<128x8xbf16>
    %cst_49 = arith.constant dense<0.000000e+00> : vector<4x8xf32>
    %53 = tpu.matmul %9, %52, %cst_49 {dimension_numbers = #tpu.dot_dimension_numbers<[1], [0], [0], [1], [0, 0, 1, 1], [], []>} : vector<4x128xbf16>, vector<128x8xbf16>, vector<4x8xf32> -> vector<4x8xf32>
    %54 = arith.truncf %53 : vector<4x8xf32> to vector<4x8xbf16>
    %c5_50 = arith.constant 5 : index
    %c0_51 = arith.constant 0 : index
    %c0_52 = arith.constant 0 : index
    %55 = vector.load %arg5[%c5_50, %c0_51, %c0_52] : memref<9x36x4xbf16, #tpu.memory_space<vmem>>, vector<1x36x4xbf16>
    %56 = vector.shape_cast %55 : vector<1x36x4xbf16> to vector<36x4xbf16>
    %cst_53 = arith.constant dense<0.000000e+00> : vector<36x8xf32>
    %57 = tpu.matmul %56, %54, %cst_53 {dimension_numbers = #tpu.dot_dimension_numbers<[1], [0], [0], [1], [0, 0, 1, 1], [], []>} : vector<36x4xbf16>, vector<4x8xbf16>, vector<36x8xf32> -> vector<36x8xf32>
    %58 = arith.addf %50, %57 : vector<36x8xf32>
    %c6 = arith.constant 6 : index
    %c0_54 = arith.constant 0 : index
    %c0_55 = arith.constant 0 : index
    %59 = vector.load %arg6[%c6, %c0_54, %c0_55] : memref<9x128x8xbf16, #tpu.memory_space<vmem>>, vector<1x128x8xbf16>
    %60 = vector.shape_cast %59 : vector<1x128x8xbf16> to vector<128x8xbf16>
    %cst_56 = arith.constant dense<0.000000e+00> : vector<4x8xf32>
    %61 = tpu.matmul %9, %60, %cst_56 {dimension_numbers = #tpu.dot_dimension_numbers<[1], [0], [0], [1], [0, 0, 1, 1], [], []>} : vector<4x128xbf16>, vector<128x8xbf16>, vector<4x8xf32> -> vector<4x8xf32>
    %62 = arith.truncf %61 : vector<4x8xf32> to vector<4x8xbf16>
    %c6_57 = arith.constant 6 : index
    %c0_58 = arith.constant 0 : index
    %c0_59 = arith.constant 0 : index
    %63 = vector.load %arg5[%c6_57, %c0_58, %c0_59] : memref<9x36x4xbf16, #tpu.memory_space<vmem>>, vector<1x36x4xbf16>
    %64 = vector.shape_cast %63 : vector<1x36x4xbf16> to vector<36x4xbf16>
    %cst_60 = arith.constant dense<0.000000e+00> : vector<36x8xf32>
    %65 = tpu.matmul %64, %62, %cst_60 {dimension_numbers = #tpu.dot_dimension_numbers<[1], [0], [0], [1], [0, 0, 1, 1], [], []>} : vector<36x4xbf16>, vector<4x8xbf16>, vector<36x8xf32> -> vector<36x8xf32>
    %66 = arith.addf %58, %65 : vector<36x8xf32>
    %c7 = arith.constant 7 : index
    %c0_61 = arith.constant 0 : index
    %c0_62 = arith.constant 0 : index
    %67 = vector.load %arg6[%c7, %c0_61, %c0_62] : memref<9x128x8xbf16, #tpu.memory_space<vmem>>, vector<1x128x8xbf16>
    %68 = vector.shape_cast %67 : vector<1x128x8xbf16> to vector<128x8xbf16>
    %cst_63 = arith.constant dense<0.000000e+00> : vector<4x8xf32>
    %69 = tpu.matmul %9, %68, %cst_63 {dimension_numbers = #tpu.dot_dimension_numbers<[1], [0], [0], [1], [0, 0, 1, 1], [], []>} : vector<4x128xbf16>, vector<128x8xbf16>, vector<4x8xf32> -> vector<4x8xf32>
    %70 = arith.truncf %69 : vector<4x8xf32> to vector<4x8xbf16>
    %c7_64 = arith.constant 7 : index
    %c0_65 = arith.constant 0 : index
    %c0_66 = arith.constant 0 : index
    %71 = vector.load %arg5[%c7_64, %c0_65, %c0_66] : memref<9x36x4xbf16, #tpu.memory_space<vmem>>, vector<1x36x4xbf16>
    %72 = vector.shape_cast %71 : vector<1x36x4xbf16> to vector<36x4xbf16>
    %cst_67 = arith.constant dense<0.000000e+00> : vector<36x8xf32>
    %73 = tpu.matmul %72, %70, %cst_67 {dimension_numbers = #tpu.dot_dimension_numbers<[1], [0], [0], [1], [0, 0, 1, 1], [], []>} : vector<36x4xbf16>, vector<4x8xbf16>, vector<36x8xf32> -> vector<36x8xf32>
    %74 = arith.addf %66, %73 : vector<36x8xf32>
    %c8 = arith.constant 8 : index
    %c0_68 = arith.constant 0 : index
    %c0_69 = arith.constant 0 : index
    %75 = vector.load %arg6[%c8, %c0_68, %c0_69] : memref<9x128x8xbf16, #tpu.memory_space<vmem>>, vector<1x128x8xbf16>
    %76 = vector.shape_cast %75 : vector<1x128x8xbf16> to vector<128x8xbf16>
    %cst_70 = arith.constant dense<0.000000e+00> : vector<4x8xf32>
    %77 = tpu.matmul %9, %76, %cst_70 {dimension_numbers = #tpu.dot_dimension_numbers<[1], [0], [0], [1], [0, 0, 1, 1], [], []>} : vector<4x128xbf16>, vector<128x8xbf16>, vector<4x8xf32> -> vector<4x8xf32>
    %78 = arith.truncf %77 : vector<4x8xf32> to vector<4x8xbf16>
    %c8_71 = arith.constant 8 : index
    %c0_72 = arith.constant 0 : index
    %c0_73 = arith.constant 0 : index
    %79 = vector.load %arg5[%c8_71, %c0_72, %c0_73] : memref<9x36x4xbf16, #tpu.memory_space<vmem>>, vector<1x36x4xbf16>
    %80 = vector.shape_cast %79 : vector<1x36x4xbf16> to vector<36x4xbf16>
    %cst_74 = arith.constant dense<0.000000e+00> : vector<36x8xf32>
    %81 = tpu.matmul %80, %78, %cst_74 {dimension_numbers = #tpu.dot_dimension_numbers<[1], [0], [0], [1], [0, 0, 1, 1], [], []>} : vector<36x4xbf16>, vector<4x8xbf16>, vector<36x8xf32> -> vector<36x8xf32>
    %82 = arith.addf %74, %81 : vector<36x8xf32>
    %c0_75 = arith.constant 0 : index
    %c0_76 = arith.constant 0 : index
    %83 = vector.load %arg7[%c0_75, %c0_76] : memref<1x8xf32, #tpu.memory_space<vmem>>, vector<1x8xf32>
    %84 = vector.broadcast %83 : vector<1x8xf32> to vector<36x8xf32>
    %85 = arith.addf %82, %84 : vector<36x8xf32>
    %c0_77 = arith.constant 0 : index
    %c0_78 = arith.constant 0 : index
    %c0_79 = arith.constant 0 : index
    %86 = vector.load %arg8[%c0_77, %c0_78, %c0_79] : memref<1x36x8xf32, #tpu.memory_space<vmem>>, vector<1x36x8xf32>
    %87 = vector.shape_cast %86 : vector<1x36x8xf32> to vector<36x8xf32>
    %88 = vector.shape_cast %85 : vector<36x8xf32> to vector<1x36x8xf32>
    tpu.vector_store %arg8[%c0_77, %c0_78, %c0_79], %88 {strides = array<i32>} : memref<1x36x8xf32, #tpu.memory_space<vmem>>, vector<1x36x8xf32>,
    return
  }
  func.func @transform_0(%arg0: i32) -> (i32, i32, i32) {
    %c0_i32 = arith.constant 0 : i32
    %c0_i32_0 = arith.constant 0 : i32
    %c0_i32_1 = arith.constant 0 : i32
    return %arg0, %c0_i32, %c0_i32_0 : i32, i32, i32
  }
  func.func @transform_1(%arg0: i32) -> (i32, i32, i32) {
    %c0_i32 = arith.constant 0 : i32
    %c0_i32_0 = arith.constant 0 : i32
    %c0_i32_1 = arith.constant 0 : i32
    return %arg0, %c0_i32, %c0_i32_0 : i32, i32, i32
  }
  func.func @transform_2(%arg0: i32) -> (i32, i32) {
    %c0_i32 = arith.constant 0 : i32
    %c0_i32_0 = arith.constant 0 : i32
    %c0_i32_1 = arith.constant 0 : i32
    return %c0_i32, %c0_i32_0 : i32, i32
  }
  func.func @transform_3(%arg0: i32) -> (i32, i32) {
    %c0_i32 = arith.constant 0 : i32
    %c0_i32_0 = arith.constant 0 : i32
    %c0_i32_1 = arith.constant 0 : i32
    return %c0_i32, %c0_i32_0 : i32, i32
  }
  func.func @transform_4(%arg0: i32) -> (i32, i32, i32) {
    %c0_i32 = arith.constant 0 : i32
    %c0_i32_0 = arith.constant 0 : i32
    %c0_i32_1 = arith.constant 0 : i32
    %c0_i32_2 = arith.constant 0 : i32
    return %c0_i32, %c0_i32_0, %c0_i32_1 : i32, i32, i32
  }
  func.func @transform_5(%arg0: i32) -> (i32, i32, i32) {
    %c0_i32 = arith.constant 0 : i32
    %c0_i32_0 = arith.constant 0 : i32
    %c0_i32_1 = arith.constant 0 : i32
    %c0_i32_2 = arith.constant 0 : i32
    return %c0_i32, %c0_i32_0, %c0_i32_1 : i32, i32, i32
  }
  func.func @transform_6(%arg0: i32) -> (i32, i32) {
    %c0_i32 = arith.constant 0 : i32
    %c0_i32_0 = arith.constant 0 : i32
    %c0_i32_1 = arith.constant 0 : i32
    return %c0_i32, %c0_i32_0 : i32, i32
  }
  func.func @transform_7(%arg0: i32) -> (i32, i32, i32) {
    %c0_i32 = arith.constant 0 : i32
    %c0_i32_0 = arith.constant 0 : i32
    %c0_i32_1 = arith.constant 0 : i32
    return %arg0, %c0_i32, %c0_i32_0 : i32, i32, i32
  }
}

</mosaic_0001>

<bundles_post_ra>
// kernel: decoder_forward.1
= control target key start
LH: loop header
LB: loop body
LE: loop exit
PB: predicated region body
PF: predicated region fallthrough
CT: control target
= control target key end

     0   :  { %12 = vsyncpa [#allocation3], 0  ;;  %s4555_s0 = inlined_call_operand.vmem [shape: bf16[2,4,2048], index: 0, kind: input, shape index: {}]   ;;  %s4556_s1 = inlined_call_operand.vmem [shape: bf16[2,4,48], index: 1, kind: input, shape index: {}]   ;;  %s4557_s2 = inlined_call_operand.hbm [shape: bf16[2048,128], index: 2, kind: input, shape index: {}]   ;;  %s4558_s3 = inlined_call_operand.vmem [shape: bf16[48,128], index: 3, kind: input, shape index: {}]   ;;  %s4559_s4 = inlined_call_operand.vmem [shape: bf16[9,36,4], index: 4, kind: input, shape index: {}]   ;;  %s4560_s5 = inlined_call_operand.hbm [shape: bf16[9,128,8], index: 5, kind: input, shape index: {}]   ;;  %s4561_s6 = inlined_call_operand.vmem [shape: f32[1,8], index: 6, kind: input, shape index: {}]   ;;  %s4562_s7 = inlined_call_operand.vmem [shape: f32[2,36,8], index: 7, kind: output, shape index: {}]  }
   0x1   :  { %13 = vsyncpa [#allocation5], 0  ;;  %s4331_s24 = smov 0  }
   0x2 LB: > { %s218_s27 = sshll.u32 %s4557_s2, 4  ;;  %s2988_s28 = sadd.s32 4294967295, %s4285_s24   ;;  %s4285_s24 = sphi %s4331_s24, %s19_s24   ;;  %s219_s27 = int_to_ptr.hbm [resolvable:$true] %s218_s27 }
   0x3   : > { %p2990_p0 = scmp.ge.s32.totalorder %s4285_s24, 1  ;;  %p207_p1 = scmp.lt.s32.totalorder %s4285_s24, 3 }
   0x4   : > { %p4194_p2 = scmp.eq.s32.totalorder %s2988_s28, 0  ;;  %s4287_s30 = smov [#allocation2]  }
   0x5   : > { %p4342_p3 = pnand %p2990_p0, %p207_p1  ;;  %s220_s8 = sshll.u32 %s4287_s30, 4  ;;  %s221_s8 = int_to_ptr.vmem [resolvable:$true] %s220_s8 }
   0x6   : > { %s238_s11 = sshll.u32 %s4560_s5, 4  ;;  %s4288_s12 = smov [#allocation4]   ;;  %s239_s11 = int_to_ptr.hbm [resolvable:$true] %s238_s11 }
   0x7   : > { %p4187_p4 = pneg %p4342_p3  ;;  %s240_s13 = sshll.u32 %s4288_s12, 4  ;;  %s241_s13 = int_to_ptr.vmem [resolvable:$true] %s240_s13 }
   0x8   : > { %s4289_s14 = smov 64   ;;  %s4290_s15 = smov 4  }
   0x9   : > { %p4188_p5 = pnand %p4194_p2, %p4187_p4  ;;  %274 = sbr.rel (%p4342_p3) target bundleno = 979 (0x3d3), region = 48 }
   0xb   : > { %4190 = dma.hbm_to_vmem [thread:$0]  (!%p4188_p5), %s219_s27, 16384, %s221_s8, [#allocation3], %s4289_s14, %s4289_s14, %s4290_s15  }
   0xc   : > { %4193 = dma.hbm_to_vmem [thread:$0]  (!%p4188_p5), %s239_s11, 9216, %s241_s13, [#allocation5], %s4289_s14, %s4289_s14, %s4290_s15  }
   0xe   : > { %4276 = dma.done.wait (%p4194_p2), [#allocation3], 16384  }
   0xf   : > { %4278 = vsyncadd (%p4194_p2), [#allocation3], 4294950912 }
  0x10   : > { %4280 = dma.done.wait (%p4194_p2), [#allocation5], 9216  }
  0x11   : > { %4282 = vsyncadd (%p4194_p2), [#allocation5], 4294958080  ;;  %p316_p6 = scmp.lt.s32.totalorder %s2988_s28, 1  ;;  %v4086_v0 = vld [vmem:[%s4558_s3 + $0x10] sm:$0xff]  ;;  %v3963_v1 = vld [vmem:[#allocation2 + $0x38] sm:$0xff]  ;;  %vm616_vm0 = vcmask 392192  }
  0x12   : > { %v3971_v2 = vld [vmem:[#allocation2 + $0x78] sm:$0xff]  ;;  %625 = vmatpush.bf16.msra.mxu0 %v4086_v0  ;;  %1442 = vmatpush.bf16.msra.mxu1 %v3963_v1  ;;  %v4085_v4 = vld [vmem:[%s4558_s3 + $0x8] sm:$0xff]  ;;  %v3962_v5 = vld [vmem:[#allocation2 + $0x30] sm:$0xff]  ;;  %vm1842_vm1 = vcmask 1041408   ;;  %vm1832_vm2 = vcmask 31744   ;;  %vm2892_vm3 = vcmask 64512  }
  0x13   : > { %s4565_s28 = smov (!%p316_p6, %s2988_s28), 1  ;;  %v3979_v3 = vld [vmem:[#allocation2 + $0xb8] sm:$0xff]  ;;  %1455 = vmatpush.bf16.msra.mxu2 %v3971_v2  ;;  %v3970_v6 = vld [vmem:[#allocation2 + $0x70] sm:$0xff]  ;;  %v3961_v9 = vld [vmem:[#allocation2 + $0x28] sm:$0xff]  ;;  %vm2897_vm4 = vcmask 60416  }
  0x14   : > { %1468 = vmatpush.bf16.msra.mxu3 %v3979_v3  ;;  %v3978_v7 = vld [vmem:[#allocation2 + $0xb0] sm:$0xff]  ;;  %s3955_s20 = sshll.u32 %s4565_s28, 5  ;;  %v4084_v8 = vld [vmem:[%s4558_s3] sm:$0xff]  ;;  %s2999_s23 = sshll.u32 %s4565_s28, 1  ;;  %v3969_v10 = vld [vmem:[#allocation2 + $0x68] sm:$0xff] }
  0x15   : > { %v3977_v11 = vld [vmem:[#allocation2 + $0xa8] sm:$0xff]  ;;  %s4374_s27 = scalar_lea.vmem %s4555_s0, %s3955_s20  ;;  %v3987_v12 = vld [vmem:[#allocation2 + $0xf8] sm:$0xff]  ;;  %s324_s8 = scalar_lea.vmem %s4556_s1, %s2999_s23  ;;  %v3960_v13 = vld [vmem:[#allocation2 + $0x20] sm:$0xff] }
  0x16   : > { %626 = vmatpush.bf16.msra.mxu0 %v4085_v4  ;;  %1443 = vmatpush.bf16.msra.mxu1 %v3962_v5  ;;  %v331_v14 = vld [vmem:[%s4374_s27] sm:$0xff]  ;;  %v3968_v15 = vld [vmem:[#allocation2 + $0x60] sm:$0xff]  ;;  %v3986_v18 = vld [vmem:[#allocation2 + $0xf0] sm:$0xff]  ;;  %s4178_s21 = smul.u32 40, %s4565_s28 }
  0x17   : > { %1456 = vmatpush.bf16.msra.mxu2 %v3970_v6  ;;  %v3976_v16 = vld [vmem:[#allocation2 + $0xa0] sm:$0xff]  ;;  %634 = vst [vmem:[#allocation1] ss:$4 sm:$0xff] %v331_v14  ;;  %v591_v19 = vld [vmem:[%s324_s8] sm:$0x3]  ;;  %v3985_v23 = vld [vmem:[#allocation2 + $0xe8] sm:$0xff] }
  0x18   : > { %1469 = vmatpush.bf16.msra.mxu3 %v3978_v7  ;;  %v332_v17 = vld [vmem:[%s4374_s27 + $0x8] sm:$0xff]  ;;  %v3959_v20 = vld [vmem:[#allocation2 + $0x18] sm:$0xff]  ;;  %v3958_v24 = vld [vmem:[#allocation2 + $0x10] sm:$0xff] }
  0x19   : > { %637 = vst [vmem:[#allocation1 + $0x20] ss:$4 sm:$0xff] %v332_v17  ;;  %v3967_v21 = vld [vmem:[#allocation2 + $0x58] sm:$0xff]  ;;  %v3966_v25 = vld [vmem:[#allocation2 + $0x50] sm:$0xff]  ;;  %v333_v27 = vld [vmem:[%s4374_s27 + $0x10] sm:$0xff] }
  0x1a   : > { %627 = vmatpush.bf16.msra.mxu0 %v4084_v8  ;;  %1444 = vmatpush.bf16.msra.mxu1 %v3961_v9  ;;  %v3975_v22 = vld [vmem:[#allocation2 + $0x98] sm:$0xff]  ;;  %v3974_v26 = vld [vmem:[#allocation2 + $0x90] sm:$0xff]  ;;  %v3984_v32 = vld [vmem:[#allocation2 + $0xe0] sm:$0xff] }
  0x1b   : > { %1457 = vmatpush.bf16.msra.mxu2 %v3969_v10  ;;  %v3957_v33 = vld [vmem:[#allocation2 + $0x8] sm:$0xff]  ;;  %v3983_v36 = vld [vmem:[#allocation2 + $0xd8] sm:$0xff]  ;;  %v3956_v37 = vld [vmem:[#allocation2] sm:$0xff] }
  0x1c   : > { %1470 = vmatpush.bf16.msra.mxu3 %v3977_v11  ;;  %v3965_v34 = vld [vmem:[#allocation2 + $0x48] sm:$0xff]  ;;  %v3964_v38 = vld [vmem:[#allocation2 + $0x40] sm:$0xff]  ;;  %v3982_v40 = vld [vmem:[#allocation2 + $0xd0] sm:$0xff] }
  0x1d   : > { %3013 = vmatmul.msk.bf16.vlgmr.msra.gmra.mxu0 %vm616_vm0, %v591_v19  ;;  %v3973_v35 = vld [vmem:[#allocation2 + $0x88] sm:$0xff]  ;;  %v3972_v39 = vld [vmem:[#allocation2 + $0x80] sm:$0xff]  ;;  %v3995_v41 = vld [vmem:[#allocation2 + $0x138] sm:$0xff] }
  0x1e   : > { %1481 = vmatpush.bf16.msrb.mxu0 %v3987_v12  ;;  %1445 = vmatpush.bf16.msra.mxu1 %v3960_v13  ;;  %v639_v28 = vld.sshfl [vmem:[#allocation1 + $0x8] sm:$0xff pattern:$0x73625140]  ;;  %v640_v29 = vld.sshfl [vmem:[#allocation1 + $0x10] sm:$0xff pattern:$0x73625140] }
  0x1f   : > { %1458 = vmatpush.bf16.msra.mxu2 %v3968_v15  ;;  %v638_v30 = vld.sshfl [vmem:[#allocation1] sm:$0xff pattern:$0x73625140]  ;;  %v641_v31 = vld.sshfl [vmem:[#allocation1 + $0x18] sm:$0xff pattern:$0x73625140] }
  0x20   : > { %1471 = vmatpush.bf16.msra.mxu3 %v3976_v16  ;;  %647 = vst [vmem:[#allocation1] ss:$4 sm:$0xff] %v333_v27  ;;  %v4003_v42 = vld [vmem:[#allocation2 + $0x178] sm:$0xff]  ;;  %v3981_v44 = vld [vmem:[#allocation2 + $0xc8] sm:$0xff]  ;;  %v3994_v45 = vld [vmem:[#allocation2 + $0x130] sm:$0xff] }
  0x21   : > { %v4011_v43 = vld [vmem:[#allocation2 + $0x1b8] sm:$0xff]  ;;  %v4002_v46 = vld [vmem:[#allocation2 + $0x170] sm:$0xff]  ;;  %v3980_v48 = vld [vmem:[#allocation2 + $0xc0] sm:$0xff] }
  0x22   : > { %1482 = vmatpush.bf16.msrb.mxu0 %v3986_v18  ;;  %1446 = vmatpush.bf16.msra.mxu1 %v3959_v20  ;;  %v4010_v47 = vld [vmem:[#allocation2 + $0x1b0] sm:$0xff]  ;;  %v3993_v49 = vld [vmem:[#allocation2 + $0x128] sm:$0xff]  ;;  %v4019_v53 = vld [vmem:[#allocation2 + $0x1f8] sm:$0xff] }
  0x23   : > { %1459 = vmatpush.bf16.msra.mxu2 %v3967_v21  ;;  %v4001_v50 = vld [vmem:[#allocation2 + $0x168] sm:$0xff]  ;;  %v334_v52 = vld [vmem:[%s4374_s27 + $0x18] sm:$0xff]  ;;  %v3992_v54 = vld [vmem:[#allocation2 + $0x120] sm:$0xff]  ;;  %s329_s27 = scalar_lea.vmem %s4562_s7, %s4178_s21 }
  0x24   : > { %1472 = vmatpush.bf16.msra.mxu3 %v3975_v22  ;;  %v4009_v51 = vld [vmem:[#allocation2 + $0x1a8] sm:$0xff]  ;;  %v642_v55 = vld.sshfl [vmem:[#allocation1 + $0x20] sm:$0xff pattern:$0x73625140]  ;;  %v4000_v59 = vld [vmem:[#allocation2 + $0x160] sm:$0xff] }
  0x25   : > { %v643_v56 = vld.sshfl [vmem:[#allocation1 + $0x28] sm:$0xff pattern:$0x73625140]  ;;  %v644_v57 = vld.sshfl [vmem:[#allocation1 + $0x30] sm:$0xff pattern:$0x73625140] }
  0x26   : > { %1483 = vmatpush.bf16.msrb.mxu0 %v3985_v23  ;;  %1447 = vmatpush.bf16.msra.mxu1 %v3958_v24  ;;  %v4383_v58 = vld.sshfl [vmem:[#allocation1 + $0x38] sm:$0xff pattern:$0x73625140]  ;;  %v4008_v60 = vld [vmem:[#allocation2 + $0x1a0] sm:$0xff]  ;;  %v3991_v62 = vld [vmem:[#allocation2 + $0x118] sm:$0xff] }
  0x27   : > { %1460 = vmatpush.bf16.msra.mxu2 %v3966_v25  ;;  %649 = vst [vmem:[#allocation1 + $0x20] ss:$4 sm:$0xff] %v334_v52  ;;  %v4018_v61 = vld [vmem:[#allocation2 + $0x1f0] sm:$0xff]  ;;  %v3999_v63 = vld [vmem:[#allocation2 + $0x158] sm:$0xff]  ;;  %v4017_v1 = vld [vmem:[#allocation2 + $0x1e8] sm:$0xff] }
  0x28   : > { %1473 = vmatpush.bf16.msra.mxu3 %v3974_v26  ;;  %v4007_v0 = vld [vmem:[#allocation2 + $0x198] sm:$0xff]  ;;  %v3990_v2 = vld [vmem:[#allocation2 + $0x110] sm:$0xff]  ;;  %v4016_v5 = vld [vmem:[#allocation2 + $0x1e0] sm:$0xff] }
  0x29   : > { %v3998_v3 = vld [vmem:[#allocation2 + $0x150] sm:$0xff]  ;;  %v3989_v6 = vld [vmem:[#allocation2 + $0x108] sm:$0xff]  ;;  %v4015_v9 = vld [vmem:[#allocation2 + $0x1d8] sm:$0xff] }
  0x2a   : > { %1484 = vmatpush.bf16.msrb.mxu0 %v3984_v32  ;;  %1448 = vmatpush.bf16.msra.mxu1 %v3957_v33  ;;  %v4006_v4 = vld [vmem:[#allocation2 + $0x190] sm:$0xff]  ;;  %v3997_v7 = vld [vmem:[#allocation2 + $0x148] sm:$0xff]  ;;  %v3988_v10 = vld [vmem:[#allocation2 + $0x100] sm:$0xff] }
  0x2b   : > { %1461 = vmatpush.bf16.msra.mxu2 %v3965_v34  ;;  %v4005_v8 = vld [vmem:[#allocation2 + $0x188] sm:$0xff]  ;;  %v3996_v11 = vld [vmem:[#allocation2 + $0x140] sm:$0xff]  ;;  %v4014_v13 = vld [vmem:[#allocation2 + $0x1d0] sm:$0xff] }
  0x2c   : > { %1474 = vmatpush.bf16.msra.mxu3 %v3973_v35  ;;  %v4004_v12 = vld [vmem:[#allocation2 + $0x180] sm:$0xff]  ;;  %v4027_v14 = vld [vmem:[#allocation2 + $0x238] sm:$0xff]  ;;  %v4013_v17 = vld [vmem:[#allocation2 + $0x1c8] sm:$0xff] }
  0x2d   : > { %v4035_v15 = vld [vmem:[#allocation2 + $0x278] sm:$0xff]  ;;  %v4026_v18 = vld [vmem:[#allocation2 + $0x230] sm:$0xff]  ;;  %v4012_v21 = vld [vmem:[#allocation2 + $0x1c0] sm:$0xff] }
  0x2e   : > { %1485 = vmatpush.bf16.msrb.mxu0 %v3983_v36  ;;  %1449 = vmatpush.bf16.msra.mxu1 %v3956_v37  ;;  %v4043_v16 = vld [vmem:[#allocation2 + $0x2b8] sm:$0xff]  ;;  %v4034_v19 = vld [vmem:[#allocation2 + $0x270] sm:$0xff]  ;;  %v4025_v22 = vld [vmem:[#allocation2 + $0x228] sm:$0xff] }
  0x2f   : > { %1462 = vmatpush.bf16.msra.mxu2 %v3964_v38  ;;  %v4042_v20 = vld [vmem:[#allocation2 + $0x2b0] sm:$0xff]  ;;  %v4033_v23 = vld [vmem:[#allocation2 + $0x268] sm:$0xff]  ;;  %v4051_v25 = vld [vmem:[#allocation2 + $0x2f8] sm:$0xff] }
  0x30   : > { %1475 = vmatpush.bf16.msra.mxu3 %v3972_v39  ;;  %v4041_v24 = vld [vmem:[#allocation2 + $0x2a8] sm:$0xff]  ;;  %v4024_v26 = vld [vmem:[#allocation2 + $0x220] sm:$0xff]  ;;  %v4039_v32 = vld [vmem:[#allocation2 + $0x298] sm:$0xff] }
  0x31   : > { %1450 = vmatmul.bf16.vlgmr.msra.gmra.mxu1 %v638_v30  ;;  %v4032_v27 = vld [vmem:[#allocation2 + $0x260] sm:$0xff]  ;;  %v4023_v30 = vld [vmem:[#allocation2 + $0x218] sm:$0xff]  ;;  %v4049_v33 = vld [vmem:[#allocation2 + $0x2e8] sm:$0xff] }
  0x32   : > { %1486 = vmatpush.bf16.msrb.mxu0 %v3982_v40  ;;  %1494 = vmatpush.bf16.msrb.mxu1 %v3995_v41  ;;  %v4022_v34 = vld [vmem:[#allocation2 + $0x210] sm:$0xff]  ;;  %v4048_v37 = vld [vmem:[#allocation2 + $0x2e0] sm:$0xff]  ;;  %v4021_v38 = vld [vmem:[#allocation2 + $0x208] sm:$0xff] }
  0x33   : > { %1507 = vmatpush.bf16.msrb.mxu2 %v4003_v42  ;;  %1476 = vmatmul.bf16.vlgmr.msra.gmra.mxu3 %v640_v29  ;;  %v4050_v29 = vld [vmem:[#allocation2 + $0x2f0] sm:$0xff]  ;;  %v4029_v39 = vld [vmem:[#allocation2 + $0x248] sm:$0xff]  ;;  %v4047_v41 = vld [vmem:[#allocation2 + $0x2d8] sm:$0xff] }
  0x34   : > { %1520 = vmatpush.bf16.msrb.mxu3 %v4011_v43  ;;  %1463 = vmatmul.bf16.vlgmr.msra.gmra.mxu2 %v639_v28  ;;  %v4040_v28 = vld [vmem:[#allocation2 + $0x2a0] sm:$0xff]  ;;  %v4030_v35 = vld [vmem:[#allocation2 + $0x250] sm:$0xff]  ;;  %v4037_v40 = vld [vmem:[#allocation2 + $0x288] sm:$0xff] }
  0x35   : > { %v4038_v36 = vld [vmem:[#allocation2 + $0x290] sm:$0xff]  ;;  %v4020_v42 = vld [vmem:[#allocation2 + $0x200] sm:$0xff]  ;;  %v4045_v52 = vld [vmem:[#allocation2 + $0x2c8] sm:$0xff] }
  0x36   : > { %1487 = vmatpush.bf16.msrb.mxu0 %v3981_v44  ;;  %1495 = vmatpush.bf16.msrb.mxu1 %v3994_v45  ;;  %v4028_v43 = vld [vmem:[#allocation2 + $0x240] sm:$0xff]  ;;  %v4046_v45 = vld [vmem:[#allocation2 + $0x2d0] sm:$0xff] }
  0x37   : > { %1508 = vmatpush.bf16.msrb.mxu2 %v4002_v46  ;;  %v4036_v44 = vld [vmem:[#allocation2 + $0x280] sm:$0xff]  ;;  %v4059_v46 = vld [vmem:[#allocation2 + $0x338] sm:$0xff] }
  0x38   : > { %1521 = vmatpush.bf16.msrb.mxu3 %v4010_v47  ;;  %v4067_v47 = vld [vmem:[#allocation2 + $0x378] sm:$0xff] }
  0x3a   : > { %1488 = vmatpush.bf16.msrb.mxu0 %v3980_v48  ;;  %1496 = vmatpush.bf16.msrb.mxu1 %v3993_v49  ;;  %v4075_v48 = vld [vmem:[#allocation2 + $0x3b8] sm:$0xff] }
  0x3b   : > { %1509 = vmatpush.bf16.msrb.mxu2 %v4001_v50  ;;  %v650_v49 = vld.sshfl [vmem:[#allocation1] sm:$0xff pattern:$0x73625140]  ;;  %v651_v50 = vld.sshfl [vmem:[#allocation1 + $0x8] sm:$0xff pattern:$0x73625140] }
  0x3c   : > { %1522 = vmatpush.bf16.msrb.mxu3 %v4009_v51  ;;  %v652_v51 = vld.sshfl [vmem:[#allocation1 + $0x10] sm:$0xff pattern:$0x73625140] }
  0x3d   : > { %1489 = vmatmul.bf16.vlgmr.msrb.gmra.mxu0 %v641_v31  ;;  %v4031_v31 = vld [vmem:[#allocation2 + $0x258] sm:$0xff] }
  0x3e   : > { %1533 = vmatpush.bf16.msra.mxu0 %v4019_v53  ;;  %1497 = vmatpush.bf16.msrb.mxu1 %v3992_v54  ;;  %v4058_v53 = vld [vmem:[#allocation2 + $0x330] sm:$0xff] }
  0x3f   : > { %1510 = vmatpush.bf16.msrb.mxu2 %v4000_v59  ;;  %v4066_v54 = vld [vmem:[#allocation2 + $0x370] sm:$0xff]  ;;  %v4073_v59 = vld [vmem:[#allocation2 + $0x3a8] sm:$0xff] }
  0x40   : > { %1523 = vmatpush.bf16.msrb.mxu3 %v4008_v60  ;;  %v4083_v60 = vld [vmem:[#allocation2 + $0x3f8] sm:$0xff] }
  0x42   : > { %1534 = vmatpush.bf16.msra.mxu0 %v4018_v61  ;;  %1498 = vmatpush.bf16.msrb.mxu1 %v3991_v62  ;;  %v653_v61 = vld.sshfl [vmem:[#allocation1 + $0x18] sm:$0xff pattern:$0x73625140]  ;;  %v4056_v62 = vld [vmem:[#allocation2 + $0x320] sm:$0xff] }
  0x43   : > { %1511 = vmatpush.bf16.msrb.mxu2 %v3999_v63  ;;  %v4064_v63 = vld [vmem:[#allocation2 + $0x360] sm:$0xff] }
  0x44   : > { %1524 = vmatpush.bf16.msrb.mxu3 %v4007_v0  ;;  %v4072_v0 = vld [vmem:[#allocation2 + $0x3a0] sm:$0xff] }
  0x46   : > { %1535 = vmatpush.bf16.msra.mxu0 %v4017_v1  ;;  %1499 = vmatpush.bf16.msrb.mxu1 %v3990_v2  ;;  %v4082_v1 = vld [vmem:[#allocation2 + $0x3f0] sm:$0xff]  ;;  %v4055_v2 = vld [vmem:[#allocation2 + $0x318] sm:$0xff] }
  0x47   : > { %1512 = vmatpush.bf16.msrb.mxu2 %v3998_v3  ;;  %v4063_v3 = vld [vmem:[#allocation2 + $0x358] sm:$0xff] }
  0x48   : > { %1525 = vmatpush.bf16.msrb.mxu3 %v4006_v4  ;;  %v4071_v4 = vld [vmem:[#allocation2 + $0x398] sm:$0xff] }
  0x4a   : > { %1536 = vmatpush.bf16.msra.mxu0 %v4016_v5  ;;  %1500 = vmatpush.bf16.msrb.mxu1 %v3989_v6  ;;  %v4081_v5 = vld [vmem:[#allocation2 + $0x3e8] sm:$0xff]  ;;  %v4054_v6 = vld [vmem:[#allocation2 + $0x310] sm:$0xff] }
  0x4b   : > { %1513 = vmatpush.bf16.msrb.mxu2 %v3997_v7  ;;  %v4062_v7 = vld [vmem:[#allocation2 + $0x350] sm:$0xff] }
  0x4c   : > { %1526 = vmatpush.bf16.msrb.mxu3 %v4005_v8  ;;  %v4070_v8 = vld [vmem:[#allocation2 + $0x390] sm:$0xff] }
  0x4e   : > { %1537 = vmatpush.bf16.msra.mxu0 %v4015_v9  ;;  %1501 = vmatpush.bf16.msrb.mxu1 %v3988_v10  ;;  %v4080_v9 = vld [vmem:[#allocation2 + $0x3e0] sm:$0xff]  ;;  %v4053_v10 = vld [vmem:[#allocation2 + $0x308] sm:$0xff] }
  0x4f   : > { %1514 = vmatpush.bf16.msrb.mxu2 %v3996_v11  ;;  %v4061_v11 = vld [vmem:[#allocation2 + $0x348] sm:$0xff] }
  0x50   : > { %1527 = vmatpush.bf16.msrb.mxu3 %v4004_v12  ;;  %v4069_v12 = vld [vmem:[#allocation2 + $0x388] sm:$0xff] }
  0x51   : > { %1502 = vmatmul.bf16.vlgmr.msrb.gmra.mxu1 %v642_v55  ;;  %v4074_v55 = vld [vmem:[#allocation2 + $0x3b0] sm:$0xff] }
  0x52   : > { %1538 = vmatpush.bf16.msra.mxu0 %v4014_v13  ;;  %1546 = vmatpush.bf16.msra.mxu1 %v4027_v14  ;;  %v4079_v13 = vld [vmem:[#allocation2 + $0x3d8] sm:$0xff]  ;;  %v4052_v14 = vld [vmem:[#allocation2 + $0x300] sm:$0xff] }
  0x53   : > { %1559 = vmatpush.bf16.msra.mxu2 %v4035_v15  ;;  %1528 = vmatmul.bf16.vlgmr.msrb.gmra.mxu3 %v644_v57  ;;  %v4057_v57 = vld [vmem:[#allocation2 + $0x328] sm:$0xff]  ;;  %v4060_v15 = vld [vmem:[#allocation2 + $0x340] sm:$0xff] }
  0x54   : > { %1572 = vmatpush.bf16.msra.mxu3 %v4043_v16  ;;  %1515 = vmatmul.bf16.vlgmr.msrb.gmra.mxu2 %v643_v56  ;;  %v4044_v56 = vld [vmem:[#allocation2 + $0x2c0] sm:$0xff] }
  0x55   : > { %v4068_v16 = vld [vmem:[#allocation2 + $0x380] sm:$0xff] }
  0x56   : > { %1539 = vmatpush.bf16.msra.mxu0 %v4013_v17  ;;  %1547 = vmatpush.bf16.msra.mxu1 %v4026_v18  ;;  %v4078_v17 = vld [vmem:[#allocation2 + $0x3d0] sm:$0xff]  ;;  %v654_v18 = vld.sshfl [vmem:[#allocation1 + $0x20] sm:$0xff pattern:$0x73625140] }
  0x57   : > { %1560 = vmatpush.bf16.msra.mxu2 %v4034_v19  ;;  %v655_v19 = vld.sshfl [vmem:[#allocation1 + $0x28] sm:$0xff pattern:$0x73625140] }
  0x58   : > { %1573 = vmatpush.bf16.msra.mxu3 %v4042_v20  ;;  %v656_v20 = vld.sshfl [vmem:[#allocation1 + $0x30] sm:$0xff pattern:$0x73625140] }
  0x5a   : > { %1540 = vmatpush.bf16.msra.mxu0 %v4012_v21  ;;  %1548 = vmatpush.bf16.msra.mxu1 %v4025_v22  ;;  %v4077_v21 = vld [vmem:[#allocation2 + $0x3c8] sm:$0xff]  ;;  %v4076_v22 = vld [vmem:[#allocation2 + $0x3c0] sm:$0xff] }
  0x5b   : > { %1561 = vmatpush.bf16.msra.mxu2 %v4033_v23  ;;  %v657_v23 = vld.sshfl [vmem:[#allocation1 + $0x38] sm:$0xff pattern:$0x73625140] }
  0x5c   : > { %1574 = vmatpush.bf16.msra.mxu3 %v4041_v24 }
  0x5d   : > { %1541 = vmatmul.bf16.vlgmr.msra.gmra.mxu0 %v4383_v58  ;;  %v4065_v58 = vld [vmem:[#allocation2 + $0x368] sm:$0xff] }
  0x5e   : > { %1585 = vmatpush.bf16.msrb.mxu0 %v4051_v25  ;;  %1549 = vmatpush.bf16.msra.mxu1 %v4024_v26 }
  0x5f   : > { %1562 = vmatpush.bf16.msra.mxu2 %v4032_v27 }
  0x60   : > { %1575 = vmatpush.bf16.msra.mxu3 %v4040_v28 }
  0x62   : > { %1586 = vmatpush.bf16.msrb.mxu0 %v4050_v29  ;;  %1550 = vmatpush.bf16.msra.mxu1 %v4023_v30 }
  0x63   : > { %1563 = vmatpush.bf16.msra.mxu2 %v4031_v31 }
  0x64   : > { %1576 = vmatpush.bf16.msra.mxu3 %v4039_v32 }
  0x66   : > { %1587 = vmatpush.bf16.msrb.mxu0 %v4049_v33  ;;  %1551 = vmatpush.bf16.msra.mxu1 %v4022_v34  ;;  %v4094_v34 = vld [vmem:[#allocation4 + $0x38] sm:$0xff] }
  0x67   : > { %1564 = vmatpush.bf16.msra.mxu2 %v4030_v35 }
  0x68   : > { %1577 = vmatpush.bf16.msra.mxu3 %v4038_v36  ;;  %v4093_v36 = vld [vmem:[#allocation4 + $0x30] sm:$0xff] }
  0x6a   : > { %1588 = vmatpush.bf16.msrb.mxu0 %v4048_v37  ;;  %1552 = vmatpush.bf16.msra.mxu1 %v4021_v38 }
  0x6b   : > { %1565 = vmatpush.bf16.msra.mxu2 %v4029_v39  ;;  %v4092_v39 = vld [vmem:[#allocation4 + $0x28] sm:$0xff] }
  0x6c   : > { %1578 = vmatpush.bf16.msra.mxu3 %v4037_v40 }
  0x6e   : > { %1589 = vmatpush.bf16.msrb.mxu0 %v4047_v41  ;;  %1553 = vmatpush.bf16.msra.mxu1 %v4020_v42  ;;  %v4091_v41 = vld [vmem:[#allocation4 + $0x20] sm:$0xff]  ;;  %v4090_v42 = vld [vmem:[#allocation4 + $0x18] sm:$0xff] }
  0x6f   : > { %1566 = vmatpush.bf16.msra.mxu2 %v4028_v43 }
  0x70   : > { %1579 = vmatpush.bf16.msra.mxu3 %v4036_v44  ;;  %v4089_v44 = vld [vmem:[#allocation4 + $0x10] sm:$0xff] }
  0x71   : > { %1554 = vmatmul.bf16.vlgmr.msra.gmra.mxu1 %v650_v49 }
  0x72   : > { %1590 = vmatpush.bf16.msrb.mxu0 %v4046_v45  ;;  %1598 = vmatpush.bf16.msrb.mxu1 %v4059_v46 }
  0x73   : > { %1611 = vmatpush.bf16.msrb.mxu2 %v4067_v47  ;;  %1580 = vmatmul.bf16.vlgmr.msra.gmra.mxu3 %v652_v51  ;;  %v4087_v51 = vld [vmem:[#allocation4] sm:$0xff] }
  0x74   : > { %1624 = vmatpush.bf16.msrb.mxu3 %v4075_v48  ;;  %1567 = vmatmul.bf16.vlgmr.msra.gmra.mxu2 %v651_v50  ;;  %v4088_v48 = vld [vmem:[#allocation4 + $0x8] sm:$0xff]  ;;  %v4104_v50 = vld [vmem:[#allocation4 + $0x78] sm:$0xff] }
  0x76   : > { %1591 = vmatpush.bf16.msrb.mxu0 %v4045_v52  ;;  %1599 = vmatpush.bf16.msrb.mxu1 %v4058_v53  ;;  %v4114_v52 = vld [vmem:[#allocation4 + $0xb8] sm:$0xff]  ;;  %v4103_v53 = vld [vmem:[#allocation4 + $0x70] sm:$0xff] }
  0x77   : > { %1612 = vmatpush.bf16.msrb.mxu2 %v4066_v54 }
  0x78   : > { %1625 = vmatpush.bf16.msrb.mxu3 %v4074_v55 }
  0x7a   : > { %1592 = vmatpush.bf16.msrb.mxu0 %v4044_v56  ;;  %1600 = vmatpush.bf16.msrb.mxu1 %v4057_v57  ;;  %v4113_v56 = vld [vmem:[#allocation4 + $0xb0] sm:$0xff]  ;;  %v4102_v57 = vld [vmem:[#allocation4 + $0x68] sm:$0xff] }
  0x7b   : > { %1613 = vmatpush.bf16.msrb.mxu2 %v4065_v58 }
  0x7c   : > { %1626 = vmatpush.bf16.msrb.mxu3 %v4073_v59  ;;  %v4112_v59 = vld [vmem:[#allocation4 + $0xa8] sm:$0xff] }
  0x7d   : > { %1593 = vmatmul.bf16.vlgmr.msrb.gmra.mxu0 %v653_v61  ;;  %v4111_v61 = vld [vmem:[#allocation4 + $0xa0] sm:$0xff] }
  0x7e   : > { %1637 = vmatpush.bf16.msra.mxu0 %v4083_v60  ;;  %1601 = vmatpush.bf16.msrb.mxu1 %v4056_v62  ;;  %v4101_v60 = vld [vmem:[#allocation4 + $0x60] sm:$0xff]  ;;  %v4100_v62 = vld [vmem:[#allocation4 + $0x58] sm:$0xff] }
  0x7f   : > { %1614 = vmatpush.bf16.msrb.mxu2 %v4064_v63  ;;  %v4110_v63 = vld [vmem:[#allocation4 + $0x98] sm:$0xff] }
  0x80   : > { %1627 = vmatpush.bf16.msrb.mxu3 %v4072_v0  ;;  %v4099_v0 = vld [vmem:[#allocation4 + $0x50] sm:$0xff] }
  0x82   : > { %1638 = vmatpush.bf16.msra.mxu0 %v4082_v1  ;;  %1602 = vmatpush.bf16.msrb.mxu1 %v4055_v2  ;;  %v4109_v2 = vld [vmem:[#allocation4 + $0x90] sm:$0xff] }
  0x83   : > { %1615 = vmatpush.bf16.msrb.mxu2 %v4063_v3  ;;  %v4098_v3 = vld [vmem:[#allocation4 + $0x48] sm:$0xff] }
  0x84   : > { %1628 = vmatpush.bf16.msrb.mxu3 %v4071_v4 }
  0x86   : > { %1639 = vmatpush.bf16.msra.mxu0 %v4081_v5  ;;  %1603 = vmatpush.bf16.msrb.mxu1 %v4054_v6  ;;  %v4108_v6 = vld [vmem:[#allocation4 + $0x88] sm:$0xff] }
  0x87   : > { %1616 = vmatpush.bf16.msrb.mxu2 %v4062_v7 }
  0x88   : > { %1629 = vmatpush.bf16.msrb.mxu3 %v4070_v8  ;;  %v4097_v8 = vld [vmem:[#allocation4 + $0x40] sm:$0xff] }
  0x8a   : > { %1640 = vmatpush.bf16.msra.mxu0 %v4080_v9  ;;  %1604 = vmatpush.bf16.msrb.mxu1 %v4053_v10 }
  0x8b   : > { %1617 = vmatpush.bf16.msrb.mxu2 %v4061_v11  ;;  %v4107_v11 = vld [vmem:[#allocation4 + $0x80] sm:$0xff] }
  0x8c   : > { %1630 = vmatpush.bf16.msrb.mxu3 %v4069_v12 }
  0x8e   : > { %1641 = vmatpush.bf16.msra.mxu0 %v4079_v13  ;;  %1605 = vmatpush.bf16.msrb.mxu1 %v4052_v14 }
  0x8f   : > { %1618 = vmatpush.bf16.msrb.mxu2 %v4060_v15 }
  0x90   : > { %1631 = vmatpush.bf16.msrb.mxu3 %v4068_v16 }
  0x91   : > { %1606 = vmatmul.bf16.vlgmr.msrb.gmra.mxu1 %v654_v18 }
  0x92   : > { %1642 = vmatpush.bf16.msra.mxu0 %v4078_v17  ;;  %1619 = vmatmul.bf16.vlgmr.msrb.gmra.mxu2 %v655_v19 }
  0x93   : > { %1632 = vmatmul.bf16.vlgmr.msrb.gmra.mxu3 %v656_v20  ;;  %1715 = vmatpush.bf16.msra.mxu1 %v4094_v34 }
  0x94   : > { %1799 = vmatpush.bf16.msra.mxu2 %v4104_v50 }
  0x96   : > { %1643 = vmatpush.bf16.msra.mxu0 %v4077_v21 }
  0x97   : > { %1716 = vmatpush.bf16.msra.mxu1 %v4093_v36 }
  0x98   : > { %1800 = vmatpush.bf16.msra.mxu2 %v4103_v53  ;;  %v4106_v53 = vld [vmem:[%s4559_s4 + $0x1c] sm:$0xff] }
  0x9a   : > { %1644 = vmatpush.bf16.msra.mxu0 %v4076_v22  ;;  %v629_v24 = vpop.f32.mrf.mxu0 }
  0x9b   : > { %1717 = vmatpush.bf16.msra.mxu1 %v4092_v39  ;;  %v4130_v39 = vld [vmem:[#allocation4 + $0x118] sm:$0xff] }
  0x9c   : > { %1801 = vmatpush.bf16.msra.mxu2 %v4102_v57 }
  0x9d   : > { %1645 = vmatmul.bf16.vlgmr.msra.gmra.mxu0 %v657_v23 }
  0x9f   : > { %1718 = vmatpush.bf16.msra.mxu1 %v4091_v41  ;;  %v4128_v41 = vld [vmem:[#allocation4 + $0x108] sm:$0xff] }
  0xa0   : > { %1802 = vmatpush.bf16.msra.mxu2 %v4101_v60  ;;  %v3594_v60 = vld [vmem:[%s4559_s4 + $0x24] sm:$0x3] }
  0xa2   : > { %v631_v25 = vpop.f32.mrf.mxu0 }
  0xa3   : > { %1719 = vmatpush.bf16.msra.mxu1 %v4090_v42  ;;  %v4127_v42 = vld [vmem:[#allocation4 + $0x100] sm:$0xff] }
  0xa4   : > { %1803 = vmatpush.bf16.msra.mxu2 %v4100_v62  ;;  %v4096_v62 = vld [vmem:[%s4559_s4 + $0x8] sm:$0xff] }
  0xa7   : > { %1720 = vmatpush.bf16.msra.mxu1 %v4089_v44 }
  0xa8   : > { %1804 = vmatpush.bf16.msra.mxu2 %v4099_v0  ;;  %v1828_v0 = vunpack.c.l.b16 %v3594_v60 }
  0xab   : > { %1721 = vmatpush.bf16.msra.mxu1 %v4088_v48 }
  0xac   : > { %1805 = vmatpush.bf16.msra.mxu2 %v4098_v3 }
  0xae   : > { %v1451_v26 = vpop.f32.mrf.mxu1 }
  0xaf   : > { %v1452_v27 = vadd.f32 %v1451_v26, %v629_v24  ;;  %1722 = vmatpush.bf16.msra.mxu1 %v4087_v51 }
  0xb0   : > { %1806 = vmatpush.bf16.msra.mxu2 %v4097_v8  ;;  %v1733_v8 = vld [vmem:[%s4559_s4 + $0x10] sm:$0x3] }
  0xb3   : > { %1982 = vmatpush.bf16.msrb.mxu1 %v4114_v52  ;;  %v4105_v52 = vld [vmem:[%s4559_s4 + $0x14] sm:$0xff] }
  0xb6   : > { %v1477_v29 = vpop.f32.mrf.mxu3  ;;  %v1453_v33 = vpop.f32.mrf.mxu1 }
  0xb7   : > { %v1464_v28 = vpop.f32.mrf.mxu2  ;;  %1983 = vmatpush.bf16.msrb.mxu1 %v4113_v56  ;;  %v4122_v56 = vld [vmem:[#allocation4 + $0xe8] sm:$0xff] }
  0xb8   : > { %v1465_v30 = vadd.f32 %v1464_v28, %v1452_v27 }
  0xba   : > { %v1478_v31 = vadd.f32 %v1477_v29, %v1465_v30  ;;  %v1490_v32 = vpop.f32.mrf.mxu0 }
  0xbb   : > { %1984 = vmatpush.bf16.msrb.mxu1 %v4112_v59  ;;  %v4144_v59 = vld [vmem:[#allocation4 + $0x178] sm:$0xff] }
  0xbc   : > { %v1491_v35 = vadd.f32 %v1490_v32, %v1478_v31  ;;  %v4134_v31 = vld [vmem:[#allocation4 + $0x138] sm:$0xff] }
  0xbe   : > { %v1479_v38 = vpop.f32.mrf.mxu3 }
  0xbf   : > { %v1466_v37 = vpop.f32.mrf.mxu2  ;;  %1985 = vmatpush.bf16.msrb.mxu1 %v4111_v61  ;;  %v4131_v38 = vld [vmem:[#allocation4 + $0x120] sm:$0xff] }
  0xc0   : > { %v4132_v37 = vld [vmem:[#allocation4 + $0x128] sm:$0xff] }
  0xc2   : > { %v1492_v40 = vpop.f32.mrf.mxu0 }
  0xc3   : > { %1986 = vmatpush.bf16.msrb.mxu1 %v4110_v63  ;;  %v4129_v40 = vld [vmem:[#allocation4 + $0x110] sm:$0xff]  ;;  %v4121_v63 = vld [vmem:[#allocation4 + $0xe0] sm:$0xff] }
  0xc7   : > { %1987 = vmatpush.bf16.msrb.mxu1 %v4109_v2  ;;  %v4120_v2 = vld [vmem:[#allocation4 + $0xd8] sm:$0xff] }
  0xcb   : > { %1988 = vmatpush.bf16.msrb.mxu1 %v4108_v6  ;;  %v4142_v6 = vld [vmem:[#allocation4 + $0x168] sm:$0xff] }
  0xce   : > { %v1503_v43 = vpop.f32.mrf.mxu1 }
  0xcf   : > { %v1504_v10 = vadd.f32 %v1503_v43, %v1491_v35  ;;  %1989 = vmatpush.bf16.msrb.mxu1 %v4107_v11  ;;  %v4133_v35 = vld [vmem:[#allocation4 + $0x130] sm:$0xff]  ;;  %v1878_v11 = vunpack.c.l.b16 %v1733_v8  ;;  %v4152_v8 = vld [vmem:[#allocation4 + $0x1a8] sm:$0xff] }
  0xd6   : > { %v1529_v46 = vpop.f32.mrf.mxu3  ;;  %v1505_v47 = vpop.f32.mrf.mxu1 }
  0xd7   : > { %v1516_v45 = vpop.f32.mrf.mxu2 }
  0xd8   : > { %v1517_v12 = vadd.f32 %v1516_v45, %v1504_v10  ;;  %v4118_v10 = vld [vmem:[#allocation4 + $0xc8] sm:$0xff] }
  0xda   : > { %v1542_v49 = vpop.f32.mrf.mxu0  ;;  %v1530_v15 = vadd.f32 %v1529_v46, %v1517_v12  ;;  %v4095_v46 = vld [vmem:[%s4559_s4] sm:$0xff] }
  0xdc   : > { %v1543_v17 = vadd.f32 %v1542_v49, %v1530_v15  ;;  %v4124_v49 = vld [vmem:[#allocation4 + $0xf8] sm:$0xff]  ;;  %v1881_v15 = vpack.c.b16 %v1878_v11, %v1878_v11 }
  0xde   : > { %v1531_v55 = vpop.f32.mrf.mxu3 }
  0xdf   : > { %v1518_v54 = vpop.f32.mrf.mxu2 }
  0xe0   : > { %v4123_v54 = vld [vmem:[#allocation4 + $0xf0] sm:$0xff] }
  0xe2   : > { %v1544_v58 = vpop.f32.mrf.mxu0 }
  0xee   : > { %v1555_v1 = vpop.f32.mrf.mxu1 }
  0xef   : > { %v1556_v18 = vadd.f32 %v1555_v1, %v1543_v17  ;;  %v4143_v1 = vld [vmem:[#allocation4 + $0x170] sm:$0xff] }
  0xf0   : > { %v4139_v17 = vld [vmem:[#allocation4 + $0x150] sm:$0xff] }
  0xf6   : > { %v1581_v5 = vpop.f32.mrf.mxu3  ;;  %v1557_v7 = vpop.f32.mrf.mxu1 }
  0xf7   : > { %v1568_v4 = vpop.f32.mrf.mxu2  ;;  %v4119_v7 = vld [vmem:[#allocation4 + $0xd0] sm:$0xff] }
  0xf8   : > { %v1569_v19 = vadd.f32 %v1568_v4, %v1556_v18  ;;  %v1831_v4 = vpack.c.b16 %v1828_v0, %v1828_v0 }
  0xfa   : > { %v1594_v9 = vpop.f32.mrf.mxu0  ;;  %v1582_v20 = vadd.f32 %v1581_v5, %v1569_v19  ;;  %v4115_v5 = vld [vmem:[%s4559_s4 + $0x28] sm:$0xff] }
  0xfc   : > { %v1595_v22 = vadd.f32 %v1594_v9, %v1582_v20  ;;  %v4141_v9 = vld [vmem:[#allocation4 + $0x160] sm:$0xff]  ;;  %v4116_v20 = vld [vmem:[%s4559_s4 + $0x30] sm:$0xff] }
  0xfe   : > { %v1583_v14 = vpop.f32.mrf.mxu3 }
  0xff   : > { %v1570_v13 = vpop.f32.mrf.mxu2 }
 0x100   : > { %v4140_v13 = vld [vmem:[#allocation4 + $0x158] sm:$0xff] }
 0x102   : > { %v1596_v16 = vpop.f32.mrf.mxu0 }
 0x103   : > { %v4117_v16 = vld [vmem:[#allocation4 + $0xc0] sm:$0xff] }
 0x10e   : > { %v1607_v21 = vpop.f32.mrf.mxu1 }
 0x10f   : > { %v1608_v23 = vadd.f32 %v1607_v21, %v1595_v22  ;;  %v4138_v21 = vld [vmem:[#allocation4 + $0x148] sm:$0xff]  ;;  %v4164_v22 = vld [vmem:[#allocation4 + $0x1f8] sm:$0xff] }
 0x115   : > { %v1620_v24 = vpop.f32.mrf.mxu2 }
 0x116   : > { %v1633_v25 = vpop.f32.mrf.mxu3  ;;  %v1621_v26 = vadd.f32 %v1620_v24, %v1608_v23  ;;  %v1609_v27 = vpop.f32.mrf.mxu1  ;;  %v4137_v23 = vld [vmem:[#allocation4 + $0x140] sm:$0xff]  ;;  %v4163_v24 = vld [vmem:[#allocation4 + $0x1f0] sm:$0xff] }
 0x118   : > { %v1634_v28 = vadd.f32 %v1633_v25, %v1621_v26  ;;  %v3653_v25 = vld [vmem:[%s4559_s4 + $0x38] sm:$0x3]  ;;  %v4162_v26 = vld [vmem:[#allocation4 + $0x1e8] sm:$0xff] }
 0x119   : > { %v2011_v27 = vunpack.c.l.b16 %v3653_v25  ;;  %v4174_v25 = vld [vmem:[#allocation4 + $0x238] sm:$0xff] }
 0x11a   : > { %v1646_v29 = vpop.f32.mrf.mxu0 }
 0x11b   : > { %v1647_v30 = vadd.f32 %v1646_v29, %v1634_v28  ;;  %v4161_v28 = vld [vmem:[#allocation4 + $0x1e0] sm:$0xff]  ;;  %v2014_v29 = vpack.c.b16 %v2011_v27, %v2011_v27 }
 0x11d   : > { %v4386_v32 = vpack.c.bf16 %v1647_v30, %v1647_v30  ;;  %v1622_v33 = vpop.f32.mrf.mxu2  ;;  %v4135_v30 = vld [vmem:[%s4559_s4 + $0x50] sm:$0xff] }
 0x11e   : > { %v1635_v34 = vpop.f32.mrf.mxu3  ;;  %v4159_v33 = vld [vmem:[#allocation4 + $0x1d0] sm:$0xff] }
 0x11f   : > { %1723 = vmatmul.bf16.vlgmr.msra.gmra.mxu1 %v4386_v32  ;;  %1807 = vmatmul.bf16.vlgmr.msra.gmra.mxu2 %v4386_v32  ;;  %v4158_v34 = vld [vmem:[#allocation4 + $0x1c8] sm:$0xff] }
 0x120   : > { %2258 = vmatpush.bf16.msra.mxu1 %v4134_v31  ;;  %v4160_v31 = vld [vmem:[#allocation4 + $0x1d8] sm:$0xff] }
 0x122   : > { %v1648_v36 = vpop.f32.mrf.mxu0 }
 0x123   : > { %v4136_v36 = vld [vmem:[%s4559_s4 + $0x58] sm:$0xff] }
 0x124   : > { %2259 = vmatpush.bf16.msra.mxu1 %v4133_v35  ;;  %v4157_v35 = vld [vmem:[#allocation4 + $0x1c0] sm:$0xff] }
 0x128   : > { %2260 = vmatpush.bf16.msra.mxu1 %v4132_v37  ;;  %v3749_v37 = vld [vmem:[%s4559_s4 + $0x60] sm:$0x3] }
 0x12c   : > { %2261 = vmatpush.bf16.msra.mxu1 %v4131_v38  ;;  %v2287_v38 = vunpack.c.l.b16 %v3749_v37  ;;  %v4146_v37 = vld [vmem:[%s4559_s4 + $0x6c] sm:$0xff] }
 0x12f   : > { %1990 = vmatmul.bf16.vlgmr.msrb.gmra.mxu1 %v4386_v32 }
 0x130   : > { %2262 = vmatpush.bf16.msra.mxu1 %v4130_v39  ;;  %v2290_v39 = vpack.c.b16 %v2287_v38, %v2287_v38  ;;  %v4169_v38 = vld [vmem:[#allocation4 + $0x210] sm:$0xff] }
 0x134   : > { %2263 = vmatpush.bf16.msra.mxu1 %v4129_v40 }
 0x138   : > { %2264 = vmatpush.bf16.msra.mxu1 %v4128_v41 }
 0x13c   : > { %2265 = vmatpush.bf16.msra.mxu1 %v4127_v42 }
 0x13f   : > { %2266 = vmatmul.bf16.vlgmr.msra.gmra.mxu1 %v4386_v32 }
 0x19c   : > { %v1724_v43 = vpop.f32.mrf.mxu1 }
 0x19d   : > { %v1728_v44 = vpack.c.bf16 %v1724_v43, %v1724_v43 }
 0x19f   : > { %v1892_v45 = vsel %vm1842_vm1, %v1728_v44, 0 }
 0x1a0   : > { %1901 = vmatpush.bf16.msrb.mxu0 %v1892_v45 }
 0x1a2   : > { %v1808_v47 = vpop.f32.mrf.mxu2 }
 0x1a3   : > { %v1812_v48 = vpack.c.bf16 %v1808_v47, %v1808_v47  ;;  %3614 = vmatmul.msk.bf16.vlgmr.msrb.gmra.mxu0 %vm1832_vm2, %v4095_v46 }
 0x1a4   : > { %v1726_v50 = vpop.f32.mrf.mxu1 }
 0x1a5   : > { %v1844_v51 = vsel %vm1842_vm1, %v1812_v48, 0 }
 0x1a6   : > { %1853 = vmatpush.bf16.msrb.mxu2 %v1844_v51  ;;  %4177 = vmatpush.bf16.msra.mxu3 %v1844_v51 }
 0x1a9   : > { %3603 = vmatmul.msk.bf16.vlgmr.msrb.gmra.mxu2 %vm1832_vm2, %v4105_v52  ;;  %3604 = vmatmul.msk.bf16.vlgmr.msra.gmra.mxu3 %vm1832_vm2, %v4106_v53 }
 0x1aa   : > { %2120 = vmatpush.bf16.msrb.mxu3 %v4124_v49  ;;  %v1810_v55 = vpop.f32.mrf.mxu2 }
 0x1ac   : > { %v1991_v57 = vpop.f32.mrf.mxu1 }
 0x1ad   : > { %v1995_v58 = vpack.c.bf16 %v1991_v57, %v1991_v57 }
 0x1ae   : > { %2121 = vmatpush.bf16.msrb.mxu3 %v4123_v54 }
 0x1af   : > { %v2025_v61 = vsel %vm1842_vm1, %v1995_v58, 0 }
 0x1b0   : > { %2034 = vmatpush.bf16.msra.mxu2 %v2025_v61 }
 0x1b2   : > { %2122 = vmatpush.bf16.msrb.mxu3 %v4122_v56 }
 0x1b3   : > { %3615 = vmatmul.msk.bf16.gmra.mxu0 %vm1832_vm2, %v4096_v62 }
 0x1b4   : > { %2396 = vmatpush.bf16.msrb.mxu2 %v4144_v59  ;;  %v1993_v3 = vpop.f32.mrf.mxu1 }
 0x1b5   : > { %v4125_v3 = vld [vmem:[%s4559_s4 + $0x3c] sm:$0xff] }
 0x1b6   : > { %2123 = vmatpush.bf16.msrb.mxu3 %v4121_v63 }
 0x1b8   : > { %2397 = vmatpush.bf16.msrb.mxu2 %v4143_v1  ;;  %v4154_v1 = vld [vmem:[#allocation4 + $0x1b8] sm:$0xff] }
 0x1b9   : > { %3605 = vmatmul.msk.bf16.gmra.mxu3 %vm1832_vm2, %v1831_v4  ;;  %3662 = vmatmul.msk.bf16.vlgmr.msra.gmra.mxu2 %vm1832_vm2, %v4115_v5  ;;  %v4153_v4 = vld [vmem:[#allocation4 + $0x1b0] sm:$0xff] }
 0x1ba   : > { %2124 = vmatpush.bf16.msrb.mxu3 %v4120_v2 }
 0x1bc   : > { %2398 = vmatpush.bf16.msrb.mxu2 %v4142_v6  ;;  %v2267_v12 = vpop.f32.mrf.mxu1 }
 0x1bd   : > { %v2271_v14 = vpack.c.bf16 %v2267_v12, %v2267_v12 }
 0x1be   : > { %2125 = vmatpush.bf16.msrb.mxu3 %v4119_v7 }
 0x1bf   : > { %v2301_v18 = vsel %vm1842_vm1, %v2271_v14, 0  ;;  %v4126_v14 = vld [vmem:[%s4559_s4 + $0x44] sm:$0xff] }
 0x1c0   : > { %2399 = vmatpush.bf16.msrb.mxu2 %v4141_v9  ;;  %v4151_v9 = vld [vmem:[#allocation4 + $0x1a0] sm:$0xff] }
 0x1c2   : > { %2126 = vmatpush.bf16.msrb.mxu3 %v4118_v10 }
 0x1c3   : > { %3616 = vmatmul.msk.bf16.gmra.mxu0 %vm1832_vm2, %v1881_v15  ;;  %v4149_v15 = vld [vmem:[#allocation4 + $0x190] sm:$0xff] }
 0x1c4   : > { %2400 = vmatpush.bf16.msrb.mxu2 %v4140_v13  ;;  %v2269_v19 = vpop.f32.mrf.mxu1  ;;  %v4150_v13 = vld [vmem:[#allocation4 + $0x198] sm:$0xff] }
 0x1c5   : > { %v3701_v19 = vld [vmem:[%s4559_s4 + $0x4c] sm:$0x3] }
 0x1c6   : > { %2127 = vmatpush.bf16.msrb.mxu3 %v4117_v16 }
 0x1c8   : > { %2401 = vmatpush.bf16.msrb.mxu2 %v4139_v17 }
 0x1c9   : > { %3663 = vmatmul.msk.bf16.gmra.mxu2 %vm1832_vm2, %v4116_v20  ;;  %2128 = vmatmul.bf16.vlgmr.msrb.gmra.mxu3 %v4386_v32  ;;  %v4147_v20 = vld [vmem:[#allocation4 + $0x180] sm:$0xff] }
 0x1ca   : > { %2310 = vmatpush.bf16.msra.mxu3 %v2301_v18  ;;  %v4148_v18 = vld [vmem:[#allocation4 + $0x188] sm:$0xff] }
 0x1cc   : > { %2402 = vmatpush.bf16.msrb.mxu2 %v4138_v21  ;;  %v2149_v21 = vunpack.c.l.b16 %v3701_v19 }
 0x1ce   : > { %2672 = vmatpush.bf16.msrb.mxu3 %v4164_v22  ;;  %v2152_v27 = vpack.c.b16 %v2149_v21, %v2149_v21 }
 0x1d0   : > { %2403 = vmatpush.bf16.msrb.mxu2 %v4137_v23 }
 0x1d2   : > { %2673 = vmatpush.bf16.msrb.mxu3 %v4163_v24 }
 0x1d6   : > { %2674 = vmatpush.bf16.msrb.mxu3 %v4162_v26 }
 0x1d9   : > { %3664 = vmatmul.msk.bf16.gmra.mxu2 %vm1832_vm2, %v2014_v29  ;;  %3758 = vmatmul.msk.bf16.vlgmr.msra.gmra.mxu3 %vm1832_vm2, %v4135_v30  ;;  %v4173_v29 = vld [vmem:[#allocation4 + $0x230] sm:$0xff] }
 0x1da   : > { %2675 = vmatpush.bf16.msrb.mxu3 %v4161_v28  ;;  %v4145_v28 = vld [vmem:[%s4559_s4 + $0x64] sm:$0xff] }
 0x1de   : > { %2676 = vmatpush.bf16.msrb.mxu3 %v4160_v31 }
 0x1e2   : > { %2677 = vmatpush.bf16.msrb.mxu3 %v4159_v33  ;;  %v4172_v33 = vld [vmem:[#allocation4 + $0x228] sm:$0xff] }
 0x1e6   : > { %2678 = vmatpush.bf16.msrb.mxu3 %v4158_v34  ;;  %v4171_v34 = vld [vmem:[#allocation4 + $0x220] sm:$0xff] }
 0x1e9   : > { %3759 = vmatmul.msk.bf16.gmra.mxu3 %vm1832_vm2, %v4136_v36  ;;  %2404 = vmatmul.bf16.vlgmr.msrb.gmra.mxu2 %v4386_v32  ;;  %v4170_v36 = vld [vmem:[#allocation4 + $0x218] sm:$0xff] }
 0x1ea   : > { %2679 = vmatpush.bf16.msrb.mxu3 %v4157_v35 }
 0x1f9   : > { %3760 = vmatmul.msk.bf16.gmra.mxu3 %vm1832_vm2, %v2290_v39 }
 0x209   : > { %2680 = vmatmul.bf16.vlgmr.msrb.gmra.mxu3 %v4386_v32 }
 0x220   : > { %v1903_v40 = vpop.f32.mrf.mxu0 }
 0x228   : > { %v1905_v41 = vpop.f32.mrf.mxu0 }
 0x22c   : > { %v1855_v42 = vpop.f32.mrf.mxu2  ;;  %v1860_v43 = vpop.f32.mrf.mxu3 }
 0x22d   : > { %v1904_v44 = vadd.f32 %v1903_v40, %v1855_v42  ;;  %v4168_v40 = vld [vmem:[#allocation4 + $0x208] sm:$0xff]  ;;  %v4167_v42 = vld [vmem:[#allocation4 + $0x200] sm:$0xff] }
 0x230   : > { %v1908_v45 = vpop.f32.mrf.mxu0 }
 0x231   : > { %v1909_v46 = vadd.f32 %v1908_v45, %v1860_v43 }
 0x234   : > { %v1857_v47 = vpop.f32.mrf.mxu2  ;;  %v1862_v48 = vpop.f32.mrf.mxu3 }
 0x235   : > { %v1906_v49 = vadd.f32 %v1905_v41, %v1857_v47  ;;  %v3797_v41 = vld [vmem:[%s4559_s4 + $0x74] sm:$0x3] }
 0x236   : > { %v2425_v43 = vunpack.c.l.b16 %v3797_v41 }
 0x238   : > { %v1910_v50 = vpop.f32.mrf.mxu0  ;;  %v2428_v47 = vpack.c.b16 %v2425_v43, %v2425_v43 }
 0x239   : > { %v1911_v51 = vadd.f32 %v1910_v50, %v1862_v48 }
 0x23c   : > { %v1865_v52 = vpop.f32.mrf.mxu3  ;;  %v2036_v53 = vpop.f32.mrf.mxu2 }
 0x23d   : > { %v4447_v54 = vadd.f32 %v2036_v53, %v1904_v44 }
 0x240   : > { %v1913_v55 = vpop.f32.mrf.mxu0 }
 0x241   : > { %v1914_v56 = vadd.f32 %v1913_v55, %v1865_v52 }
 0x244   : > { %v1867_v57 = vpop.f32.mrf.mxu3  ;;  %v2038_v58 = vpop.f32.mrf.mxu2 }
 0x245   : > { %v4449_v59 = vadd.f32 %v2038_v58, %v1906_v49  ;;  %v4165_v58 = vld [vmem:[%s4559_s4 + $0x8c] sm:$0xff] }
 0x248   : > { %v1915_v60 = vpop.f32.mrf.mxu0 }
 0x24c   : > { %v2041_v61 = vpop.f32.mrf.mxu2  ;;  %v2129_v62 = vpop.f32.mrf.mxu3 }
 0x24d   : > { %v4451_v63 = vadd.f32 %v2041_v61, %v1909_v46  ;;  %v2133_v0 = vpack.c.bf16 %v2129_v62, %v2129_v62 }
 0x24f   : > { %v2163_v2 = vsel %vm1842_vm1, %v2133_v0, 0 }
 0x250   : > { %2172 = vmatpush.bf16.msra.mxu0 %v2163_v2 }
 0x253   : > { %3710 = vmatmul.msk.bf16.vlgmr.msra.gmra.mxu0 %vm1832_vm2, %v4125_v3 }
 0x254   : > { %2534 = vmatpush.bf16.msrb.mxu0 %v4154_v1  ;;  %v2043_v5 = vpop.f32.mrf.mxu2  ;;  %v2131_v6 = vpop.f32.mrf.mxu3  ;;  %v4166_v1 = vld [vmem:[%s4559_s4 + $0x94] sm:$0xff] }
 0x255   : > { %v4458_v7 = vadd.f32 %v2043_v5, %v1911_v51 }
 0x258   : > { %2535 = vmatpush.bf16.msrb.mxu0 %v4153_v4 }
 0x25c   : > { %2536 = vmatpush.bf16.msrb.mxu0 %v4152_v8  ;;  %v2046_v10 = vpop.f32.mrf.mxu2  ;;  %v4460_v11 = vpop.f32.mrf.mxu3 }
 0x25d   : > { %v4462_v12 = vadd.f32 %v2046_v10, %v1914_v56 }
 0x260   : > { %2537 = vmatpush.bf16.msrb.mxu0 %v4151_v9  ;;  %v4155_v9 = vld [vmem:[%s4559_s4 + $0x78] sm:$0xff] }
 0x263   : > { %3711 = vmatmul.msk.bf16.gmra.mxu0 %vm1832_vm2, %v4126_v14 }
 0x264   : > { %2538 = vmatpush.bf16.msrb.mxu0 %v4150_v13  ;;  %v2048_v16 = vpop.f32.mrf.mxu2  ;;  %v4468_v17 = vpop.f32.mrf.mxu3  ;;  %v3893_v13 = vld [vmem:[%s4559_s4 + $0x9c] sm:$0x3] }
 0x268   : > { %2539 = vmatpush.bf16.msrb.mxu0 %v4149_v15  ;;  %v2701_v15 = vunpack.c.l.b16 %v3893_v13 }
 0x26a   : > { %v2704_v16 = vpack.c.b16 %v2701_v15, %v2701_v15 }
 0x26c   : > { %2540 = vmatpush.bf16.msrb.mxu0 %v4148_v18  ;;  %v4473_v22 = vpop.f32.mrf.mxu3  ;;  %v2405_v23 = vpop.f32.mrf.mxu2 }
 0x26d   : > { %v2409_v24 = vpack.c.bf16 %v2405_v23, %v2405_v23 }
 0x26f   : > { %v2439_v26 = vsel %vm1842_vm1, %v2409_v24, 0 }
 0x270   : > { %2541 = vmatpush.bf16.msrb.mxu0 %v4147_v20  ;;  %2448 = vmatpush.bf16.msrb.mxu1 %v2439_v26  ;;  %v4156_v20 = vld [vmem:[%s4559_s4 + $0x80] sm:$0xff] }
 0x273   : > { %3712 = vmatmul.msk.bf16.gmra.mxu0 %vm1832_vm2, %v2152_v27  ;;  %3806 = vmatmul.msk.bf16.vlgmr.msrb.gmra.mxu1 %vm1832_vm2, %v4145_v28  ;;  %v4175_v28 = vld [vmem:[%s4559_s4 + $0xa0] sm:$0xff] }
 0x274   : > { %2810 = vmatpush.bf16.msra.mxu1 %v4174_v25  ;;  %v2319_v30 = vpop.f32.mrf.mxu3  ;;  %v2407_v31 = vpop.f32.mrf.mxu2 }
 0x275   : > { %v3941_v31 = vld [vmem:[%s4559_s4 + $0xb0] sm:$0x3] }
 0x278   : > { %2811 = vmatpush.bf16.msra.mxu1 %v4173_v29 }
 0x27c   : > { %2812 = vmatpush.bf16.msra.mxu1 %v4172_v33  ;;  %v2322_v35 = vpop.f32.mrf.mxu3  ;;  %v2839_v33 = vunpack.c.l.b16 %v3941_v31 }
 0x280   : > { %2813 = vmatpush.bf16.msra.mxu1 %v4171_v34  ;;  %v2842_v34 = vpack.c.b16 %v2839_v33, %v2839_v33 }
 0x283   : > { %3807 = vmatmul.msk.bf16.gmra.mxu1 %vm1832_vm2, %v4146_v37  ;;  %2542 = vmatmul.bf16.vlgmr.msrb.gmra.mxu0 %v4386_v32 }
 0x284   : > { %2814 = vmatpush.bf16.msra.mxu1 %v4170_v36  ;;  %v2324_v39 = vpop.f32.mrf.mxu3 }
 0x288   : > { %2815 = vmatpush.bf16.msra.mxu1 %v4169_v38 }
 0x28c   : > { %2816 = vmatpush.bf16.msra.mxu1 %v4168_v40  ;;  %v2681_v44 = vpop.f32.mrf.mxu3 }
 0x28d   : > { %v2685_v45 = vpack.c.bf16 %v2681_v44, %v2681_v44 }
 0x28f   : > { %v2715_v46 = vsel %vm1842_vm1, %v2685_v45, 0 }
 0x290   : > { %2817 = vmatpush.bf16.msra.mxu1 %v4167_v42  ;;  %2724 = vmatpush.bf16.msra.mxu0 %v2715_v46 }
 0x293   : > { %3808 = vmatmul.msk.bf16.gmra.mxu1 %vm1832_vm2, %v2428_v47  ;;  %3902 = vmatmul.msk.bf16.vlgmr.msra.gmra.mxu0 %vm1832_vm2, %v4165_v58  ;;  %v4210_v47 = vld [vmem:[%s4561_s6] ss:$0 sm:$0xff] }
 0x294   : > { %v2683_v48 = vpop.f32.mrf.mxu3 }
 0x2a3   : > { %2818 = vmatmul.bf16.vlgmr.msra.gmra.mxu1 %v4386_v32  ;;  %3903 = vmatmul.msk.bf16.gmra.mxu0 %vm1832_vm2, %v4166_v1 }
 0x2b3   : > { %3904 = vmatmul.msk.bf16.gmra.mxu0 %vm1832_vm2, %v2704_v16 }
 0x2d0   : > { %v2174_v49 = vpop.f32.mrf.mxu0 }
 0x2d1   : > { %v2188_v50 = vadd.f32 %v2174_v49, %v4447_v54 }
 0x2d3   : > { %v2326_v32 = vadd.f32 %v4460_v11, %v2188_v50 }
 0x2d8   : > { %v2176_v51 = vpop.f32.mrf.mxu0 }
 0x2d9   : > { %v2189_v52 = vadd.f32 %v2176_v51, %v4449_v59 }
 0x2db   : > { %v2327_v59 = vadd.f32 %v4468_v17, %v2189_v52 }
 0x2e0   : > { %v2179_v53 = vpop.f32.mrf.mxu0 }
 0x2e1   : > { %v2190_v55 = vadd.f32 %v2179_v53, %v4451_v63 }
 0x2e3   : > { %v2328_v3 = vadd.f32 %v4473_v22, %v2190_v55  ;;  %v3845_v22 = vld [vmem:[%s4559_s4 + $0x88] sm:$0x3] }
 0x2e4   : > { %v2563_v23 = vunpack.c.l.b16 %v3845_v22 }
 0x2e6   : > { %v2566_v27 = vpack.c.b16 %v2563_v23, %v2563_v23 }
 0x2e8   : > { %v2181_v56 = vpop.f32.mrf.mxu0 }
 0x2e9   : > { %v2191_v57 = vadd.f32 %v2181_v56, %v4458_v7 }
 0x2eb   : > { %v2329_v10 = vadd.f32 %v2319_v30, %v2191_v57  ;;  %v4176_v30 = vld [vmem:[%s4559_s4 + $0xa8] sm:$0xff] }
 0x2f0   : > { %v2184_v60 = vpop.f32.mrf.mxu0  ;;  %v2450_v61 = vpop.f32.mrf.mxu1 }
 0x2f1   : > { %v2192_v54 = vadd.f32 %v2184_v60, %v4462_v12  ;;  %v2464_v62 = vadd.f32 %v2450_v61, %v2326_v32 }
 0x2f3   : > { %v2330_v17 = vadd.f32 %v2322_v35, %v2192_v54 }
 0x2f8   : > { %v2186_v0 = vpop.f32.mrf.mxu0  ;;  %v2452_v63 = vpop.f32.mrf.mxu1 }
 0x2f9   : > { %v2465_v2 = vadd.f32 %v2452_v63, %v2327_v59 }
 0x300   : > { %v2455_v4 = vpop.f32.mrf.mxu1  ;;  %v2543_v5 = vpop.f32.mrf.mxu0 }
 0x301   : > { %v4508_v6 = vadd.f32 %v2455_v4, %v2328_v3  ;;  %v2547_v7 = vpack.c.bf16 %v2543_v5, %v2543_v5 }
 0x303   : > { %v2577_v8 = vsel %vm1842_vm1, %v2547_v7, 0 }
 0x304   : > { %2586 = vmatpush.bf16.msra.mxu2 %v2577_v8 }
 0x307   : > { %3854 = vmatmul.msk.bf16.vlgmr.msra.gmra.mxu2 %vm1832_vm2, %v4155_v9 }
 0x308   : > { %v2457_v11 = vpop.f32.mrf.mxu1  ;;  %v2545_v12 = vpop.f32.mrf.mxu0 }
 0x309   : > { %v2467_v14 = vadd.f32 %v2457_v11, %v2329_v10 }
 0x310   : > { %v2460_v18 = vpop.f32.mrf.mxu1  ;;  %v2726_v35 = vpop.f32.mrf.mxu0 }
 0x311   : > { %v2468_v19 = vadd.f32 %v2460_v18, %v2330_v17 }
 0x317   : > { %3855 = vmatmul.msk.bf16.gmra.mxu2 %vm1832_vm2, %v4156_v20 }
 0x318   : > { %v2462_v21 = vpop.f32.mrf.mxu1  ;;  %v2728_v36 = vpop.f32.mrf.mxu0 }
 0x320   : > { %v2819_v24 = vpop.f32.mrf.mxu1  ;;  %v2731_v37 = vpop.f32.mrf.mxu0 }
 0x321   : > { %v2823_v25 = vpack.c.bf16 %v2819_v24, %v2819_v24 }
 0x323   : > { %v2853_v26 = vsel %vm1842_vm1, %v2823_v25, 0 }
 0x324   : > { %2862 = vmatpush.bf16.msra.mxu3 %v2853_v26 }
 0x327   : > { %3856 = vmatmul.msk.bf16.gmra.mxu2 %vm1832_vm2, %v2566_v27  ;;  %3950 = vmatmul.msk.bf16.vlgmr.msra.gmra.mxu3 %vm1832_vm2, %v4175_v28 }
 0x328   : > { %v2821_v29 = vpop.f32.mrf.mxu1  ;;  %v2733_v38 = vpop.f32.mrf.mxu0 }
 0x330   : > { %v2736_v40 = vpop.f32.mrf.mxu0 }
 0x337   : > { %3951 = vmatmul.msk.bf16.gmra.mxu3 %vm1832_vm2, %v4176_v30 }
 0x338   : > { %v2738_v42 = vpop.f32.mrf.mxu0 }
 0x347   : > { %3952 = vmatmul.msk.bf16.gmra.mxu3 %vm1832_vm2, %v2842_v34 }
 0x38a   : > { %v2588_v39 = vpop.f32.mrf.mxu2 }
 0x38b   : > { %v2602_v45 = vadd.f32 %v2588_v39, %v2464_v62 }
 0x38d   : > { %v2740_v46 = vadd.f32 %v2726_v35, %v2602_v45 }
 0x392   : > { %v2590_v41 = vpop.f32.mrf.mxu2 }
 0x393   : > { %v2603_v51 = vadd.f32 %v2590_v41, %v2465_v2 }
 0x395   : > { %v2741_v53 = vadd.f32 %v2728_v36, %v2603_v51 }
 0x39a   : > { %v2593_v43 = vpop.f32.mrf.mxu2 }
 0x39b   : > { %v2604_v58 = vadd.f32 %v2593_v43, %v4508_v6 }
 0x39d   : > { %v2742_v60 = vadd.f32 %v2731_v37, %v2604_v58 }
 0x3a2   : > { %v2595_v44 = vpop.f32.mrf.mxu2 }
 0x3a3   : > { %v2605_v62 = vadd.f32 %v2595_v44, %v2467_v14 }
 0x3a5   : > { %v2743_v0 = vadd.f32 %v2733_v38, %v2605_v62 }
 0x3aa   : > { %v2598_v48 = vpop.f32.mrf.mxu2  ;;  %v2864_v49 = vpop.f32.mrf.mxu3 }
 0x3ab   : > { %v2878_v50 = vadd.f32 %v2864_v49, %v2740_v46  ;;  %v2606_v2 = vadd.f32 %v2598_v48, %v2468_v19 }
 0x3ad   : > { %v2887_v52 = vadd.f32 %v4210_v47, %v2878_v50  ;;  %v2744_v4 = vadd.f32 %v2736_v40, %v2606_v2 }
 0x3af   : > { %2893 = vst.msk [vmem:[%s329_s27] sm:$0xff] %vm2892_vm3, %v2887_v52 }
 0x3b2   : > { %v2866_v55 = vpop.f32.mrf.mxu3  ;;  %v2600_v56 = vpop.f32.mrf.mxu2 }
 0x3b3   : > { %v2879_v57 = vadd.f32 %v2866_v55, %v2741_v53 }
 0x3b5   : > { %v2888_v32 = vadd.f32 %v4210_v47, %v2879_v57 }
 0x3b7   : > { %2894 = vst.msk [vmem:[%s329_s27 + $0x8] sm:$0xff] %vm2892_vm3, %v2888_v32 }
 0x3ba   : > { %v2869_v61 = vpop.f32.mrf.mxu3 }
 0x3bb   : > { %v2880_v54 = vadd.f32 %v2869_v61, %v2742_v60 }
 0x3bd   : > { %v2889_v59 = vadd.f32 %v4210_v47, %v2880_v54 }
 0x3bf   : > { %2895 = vst.msk [vmem:[%s329_s27 + $0x10] sm:$0xff] %vm2892_vm3, %v2889_v59 }
 0x3c2   : > { %v2871_v63 = vpop.f32.mrf.mxu3 }
 0x3c3   : > { %v2881_v1 = vadd.f32 %v2871_v63, %v2743_v0 }
 0x3c5   : > { %v2890_v3 = vadd.f32 %v4210_v47, %v2881_v1 }
 0x3c7   : > { %2896 = vst.msk [vmem:[%s329_s27 + $0x18] sm:$0xff] %vm2892_vm3, %v2890_v3 }
 0x3ca   : > { %v2874_v5 = vpop.f32.mrf.mxu3 }
 0x3cb   : > { %v2882_v6 = vadd.f32 %v2874_v5, %v2744_v4 }
 0x3cd   : > { %v2891_v7 = vadd.f32 %v4210_v47, %v2882_v6 }
 0x3cf   : > { %2898 = vst.msk [vmem:[%s329_s27 + $0x20] sm:$0xf] %vm2897_vm4, %v2891_v7 }
 0x3d2   : > { %v2876_v8 = vpop.f32.mrf.mxu3 }
 0x3d3 PF: > { %s19_s24 = sadd.s32 1, %s4285_s24  }
 0x3d4   : > { %p16_p7 = scmp.ge.s32.totalorder %s19_s24, 4  }
 0x3d6   :  { %18 = sbr.rel (!%p16_p7) target bundleno = 2 (0x2), region = 107 }
 0x3db   :  { %2920 = vsyncpa [#allocation3], 1 }
 0x3dc   :  { %2922 = vsyncpa [#allocation3 + $0x1], 1 }
 0x3dd   :  { %2923 = vsyncpa [#allocation5], 1 }

</bundles_post_ra>
